<compile_context>
chip_gen: v7x
topology: tpu7x:2x2x1
jax: 0.10.0
libtpu: 0.0.40
codegen_flags: <defaults>
</compile_context>

<pallas_src>
import jax
import jax.numpy as jnp
from jax.experimental import pallas as pl
from jax.experimental.pallas import tpu as pltpu


# --------------------------------------------------------------------------
# wrapper-side layout / weight preparation
# --------------------------------------------------------------------------
def _lane_nchw(a):
    """(N, Ch, H, W) -> (N, H, W*Ch) lane-dense slab (f32)."""
    n, ch, h, w = a.shape
    return jnp.transpose(a, (0, 2, 3, 1)).reshape(n, h, w * ch).astype(jnp.float32)


def _unlane(a, C):
    """(N, H, W*C) -> (N, C, H, W)."""
    n, h, wc = a.shape
    return jnp.transpose(a.reshape(n, h, wc // C, C), (0, 3, 1, 2))


def _lane_hw(a):
    """(C, H, W) -> (H, W*C)."""
    c, h, w = a.shape
    return jnp.transpose(a, (1, 2, 0)).reshape(h, w * c).astype(jnp.float32)


def _band_weight(w_oihw, W, p, group_C, dtype):
    """OIHW conv weight -> (K, W*Cin, G*W*group_C) block-Toeplitz matrices.

    Row layout    : w_in * Cin + ci
    Column layout : g * (W*group_C) + w_out * group_C + c   (gate-group major)
    so that  out[h] = sum_kh inp_padded[h+kh] @ B[kh]  reproduces a 'same'
    KxK conv (W zero-padding lives in the band; H padding via zero halo rows).
    """
    Cout, Cin, K, _ = w_oihw.shape
    G = Cout // group_C
    whw = jnp.transpose(w_oihw, (2, 3, 1, 0)).astype(jnp.float32)      # (Kh,Kw,Cin,Cout)
    whw = whw.reshape(K, K, Cin, G, group_C)
    shift = jnp.stack([jnp.eye(W, W, k=p - kw, dtype=jnp.float32)
                       for kw in range(K)])                            # (Kw, Win, Wout)
    b = jnp.einsum("wab,hwigc->haigbc", shift, whw)                    # (Kh,Win,Cin,G,Wout,Cg)
    return b.reshape(K, W * Cin, G * W * group_C).astype(dtype)


def _lane_bias(b, W, group_C):
    """(G*group_C,) -> (1, G*W*group_C) bias in the banded-conv output layout."""
    G = b.shape[0] // group_C
    t = jnp.tile(b.astype(jnp.float32).reshape(G, 1, group_C), (1, W, 1))
    return t.reshape(1, G * W * group_C)


def _pick_nb(N, H, target_rows=128):
    """Batch items per grid step: M = NB*H ~ target, grid length >= 2 if N >= 2."""
    cap = max(1, target_rows // max(H, 1))
    if N >= 2:
        cap = min(cap, max(1, N // 2))
    nb = 1
    for d in range(1, min(cap, N) + 1):
        if N % d == 0:
            nb = d
    return nb


# --------------------------------------------------------------------------
# kernel
# --------------------------------------------------------------------------
def _make_kernel(H, W, Cin, C, K, p, NB, dt, activation, mm_dtype):
    R = NB * H                          # matmul M per grid step
    Lc, Lx = W * C, W * Cin
    Lxy = Lc + Lx
    Q = 0 if p == 0 else ((p + 15) // 16) * 16   # aligned payload offset
    act = jnp.tanh if activation == "tanh" else jax.nn.relu
    f32 = jnp.float32

    def masked_lhs(pad_ref, kh, width):
        """Row-shifted LHS for tap kh; zero rows that would bleed across items."""
        lhs = pad_ref[Q - p + kh:Q - p + kh + R, :]
        s = kh - p
        if NB > 1 and s != 0:
            rid = jnp.tile(jax.lax.broadcasted_iota(jnp.int32, (H, width), 0),
                           (NB, 1))                                   # r % H
            valid = jnp.logical_and(rid + s >= 0, rid + s < H)
            lhs = jnp.where(valid, lhs, jnp.zeros_like(lhs))
        return lhs

    def kernel(xy_ref, z_ref, wxy_ref, bxy_ref, wz_ref, bz_ref,
               wz1_ref, wz2_ref, ynew_ref, znew_ref, xpad, zpad, t_ref):
        # ---- zero only the halo rows of the staging buffers (every step;
        #      each core owns its scratch, so no pl.when(program_id==0)) ----
        if p > 0:
            xpad[Q - p:Q, :] = jnp.zeros((p, Lxy), mm_dtype)
            xpad[Q + R:Q + R + p, :] = jnp.zeros((p, Lxy), mm_dtype)
            zpad[Q - p:Q, :] = jnp.zeros((p, Lc), mm_dtype)
            zpad[Q + R:Q + R + p, :] = jnp.zeros((p, Lc), mm_dtype)

        # ---- stage fused [y | x] once in the matmul dtype (single cast) ----
        xpad[Q:Q + R, :] = xy_ref[...].astype(mm_dtype)

        # ---- fused convx+convy: K banded matmuls, accumulate in VMEM f32 ----
        # output column groups: [dt1 | dt2 | i_z | y_act], each W*C lanes
        for kh in range(K):
            contrib = jnp.dot(masked_lhs(xpad, kh, Lxy), wxy_ref[kh],
                              preferred_element_type=f32)
            if kh == 0:
                t_ref[...] = contrib
            else:
                t_ref[...] += contrib

        # ---- phase 1: z update, one batch item at a time ----
        for i in range(NB):
            r0 = i * H
            z_i = z_ref[r0:r0 + H, :]
            t_dt2 = t_ref[r0:r0 + H, Lc:2 * Lc] + bxy_ref[:, Lc:2 * Lc]
            t_y = t_ref[r0:r0 + H, 3 * Lc:4 * Lc] + bxy_ref[:, 3 * Lc:4 * Lc]
            ms_dt = dt * jax.nn.sigmoid(t_dt2 + wz2_ref[...] * z_i)
            z_new = (1.0 - ms_dt) * z_i + ms_dt * act(t_y)
            znew_ref[r0:r0 + H, :] = z_new
            zpad[Q + r0:Q + r0 + H, :] = z_new.astype(mm_dtype)

        # ---- convz(z_new): accumulate straight into the i_z column group ----
        for kh in range(K):
            t_ref[:, 2 * Lc:3 * Lc] += jnp.dot(masked_lhs(zpad, kh, Lc),
                                               wz_ref[kh],
                                               preferred_element_type=f32)

        # ---- phase 2: y update, one batch item at a time ----
        for i in range(NB):
            r0 = i * H
            y_i = xy_ref[r0:r0 + H, 0:Lc]
            z_new = znew_ref[r0:r0 + H, :]
            t_dt1 = t_ref[r0:r0 + H, 0:Lc] + bxy_ref[:, 0:Lc]
            tz_iz = (t_ref[r0:r0 + H, 2 * Lc:3 * Lc]
                     + bxy_ref[:, 2 * Lc:3 * Lc] + bz_ref[...])
            ms_dt_bar = dt * jax.nn.sigmoid(t_dt1 + wz1_ref[...] * z_new)
            ynew_ref[r0:r0 + H, :] = (1.0 - ms_dt_bar) * y_i + ms_dt_bar * act(tz_iz)

    return kernel


# --------------------------------------------------------------------------
# public wrapper (PyTorch NCHW / OIHW convention at the boundary)
# --------------------------------------------------------------------------
def conv_lem_cell_pallas(x, y, z, params, *, dt, kernel_size, padding,
                         activation="tanh", matmul_dtype=jnp.bfloat16):
    N, Cin, H, W = x.shape
    C = y.shape[1]
    K, p = kernel_size, padding
    assert K == 2 * p + 1, "requires 'same' padding (odd kernel, p=(K-1)//2)"

    Lc, Lx = W * C, W * Cin
    Lxy = Lc + Lx
    f32 = jnp.float32

    NB = _pick_nb(N, H)
    R = NB * H
    G = N // NB
    Q = 0 if p == 0 else ((p + 15) // 16) * 16

    # ---- lane-dense 2D slabs: rows = (n, h), lanes = w*ch + ch ----
    xyf = jnp.concatenate([_lane_nchw(y), _lane_nchw(x)], axis=-1)
    xyf = xyf.reshape(N * H, Lxy)                      # [y | x] per row
    zf = _lane_nchw(z).reshape(N * H, Lc)

    # ---- fused block-Toeplitz weights: rows [y | x] -> cols [dt1|dt2|iz|y] ----
    wxb = _band_weight(params["wx"], W, p, C, f32)     # (K, Lx, 4*Lc)
    wyb = _band_weight(params["wy"], W, p, C, f32)     # (K, Lc, 3*Lc)
    wxy = jnp.zeros((K, Lxy, 4 * Lc), f32)
    wxy = wxy.at[:, 0:Lc, 0:2 * Lc].set(wyb[:, :, 0:2 * Lc])            # h_dt1,h_dt2
    wxy = wxy.at[:, 0:Lc, 3 * Lc:4 * Lc].set(wyb[:, :, 2 * Lc:3 * Lc])  # h_y
    wxy = wxy.at[:, Lc:Lxy, :].set(wxb)                                 # i_dt1..i_y
    wxy = wxy.astype(matmul_dtype)
    wzb = _band_weight(params["wz"], W, p, C, matmul_dtype)             # (K, Lc, Lc)

    bx_l = _lane_bias(params["bx"], W, C)              # (1, 4*Lc)
    by_l = _lane_bias(params["by"], W, C)              # (1, 3*Lc)
    bxy = bx_l.at[:, 0:2 * Lc].add(by_l[:, 0:2 * Lc])
    bxy = bxy.at[:, 3 * Lc:4 * Lc].add(by_l[:, 2 * Lc:3 * Lc])
    bz_l = _lane_bias(params["bz"], W, C)              # (1, Lc)
    wz1_l = _lane_hw(params["w_z1"])                   # (H, Lc)
    wz2_l = _lane_hw(params["w_z2"])                   # (H, Lc)

    kernel = _make_kernel(H, W, Cin, C, K, p, NB, float(dt), activation,
                          matmul_dtype)

    grid_spec = pltpu.PrefetchScalarGridSpec(
        num_scalar_prefetch=0,
        grid=(G,),
        in_specs=[
            pl.BlockSpec((R, Lxy), lambda n: (n, 0)),             # fused [y | x]
            pl.BlockSpec((R, Lc), lambda n: (n, 0)),              # z
            pl.BlockSpec((K, Lxy, 4 * Lc), lambda n: (0, 0, 0)),  # fused banded wx+wy
            pl.BlockSpec((1, 4 * Lc), lambda n: (0, 0)),          # fused bias
            pl.BlockSpec((K, Lc, Lc), lambda n: (0, 0, 0)),       # banded wz
            pl.BlockSpec((1, Lc), lambda n: (0, 0)),              # bz
            pl.BlockSpec((H, Lc), lambda n: (0, 0)),              # W_z1
            pl.BlockSpec((H, Lc), lambda n: (0, 0)),              # W_z2
        ],
        out_specs=[
            pl.BlockSpec((R, Lc), lambda n: (n, 0)),              # y_new
            pl.BlockSpec((R, Lc), lambda n: (n, 0)),              # z_new
        ],
        scratch_shapes=[
            pltpu.VMEM((Q + R + p, Lxy), matmul_dtype),   # halo-padded [y | x]
            pltpu.VMEM((Q + R + p, Lc), matmul_dtype),    # halo-padded z_new
            pltpu.VMEM((R, 4 * Lc), jnp.float32),         # staged conv result
        ],
    )

    y2, z2 = pl.pallas_call(
        kernel,
        out_shape=(jax.ShapeDtypeStruct((N * H, Lc), f32),
                   jax.ShapeDtypeStruct((N * H, Lc), f32)),
        grid_spec=grid_spec,
        compiler_params=pltpu.CompilerParams(
            dimension_semantics=("parallel",),
            vmem_limit_bytes=32 * 1024 * 1024),
    )(xyf, zf, wxy, bxy, wzb, bz_l, wz1_l, wz2_l)

    return _unlane(y2.reshape(N, H, Lc), C), _unlane(z2.reshape(N, H, Lc), C)


# --------------------------------------------------------------------------
# pure-JAX reference (mirrors the PyTorch forward exactly, NCHW/OIHW)
# --------------------------------------------------------------------------
def conv_lem_cell_ref(x, y, z, params, *, dt, padding, activation="tanh"):
    act = jnp.tanh if activation == "tanh" else jax.nn.relu

    def conv(inp, w, b):
        out = jax.lax.conv_general_dilated(
            inp, w, window_strides=(1, 1),
            padding=[(padding, padding), (padding, padding)],
            dimension_numbers=("NCHW", "OIHW", "NCHW"))
        return out + b.reshape(1, -1, 1, 1)

    t_inp = conv(x, params["wx"], params["bx"])
    t_hid = conv(y, params["wy"], params["by"])
    i_dt1, i_dt2, i_z, i_y = jnp.split(t_inp, 4, axis=1)
    h_dt1, h_dt2, h_y = jnp.split(t_hid, 3, axis=1)
    ms_dt = dt * jax.nn.sigmoid(i_dt2 + h_dt2 + params["w_z2"] * z)
    z_new = (1.0 - ms_dt) * z + ms_dt * act(i_y + h_y)
    t_z = conv(z_new, params["wz"], params["bz"])
    ms_dt_bar = dt * jax.nn.sigmoid(i_dt1 + h_dt1 + params["w_z1"] * z_new)
    y_new = (1.0 - ms_dt_bar) * y + ms_dt_bar * act(t_z + i_z)
    return y_new, z_new


if __name__ == "__main__":
    N, Cin, C, H, W = 2, 4, 8, 16, 16
    K, p = 3, 1
    dt = 1.0

    keys = jax.random.split(jax.random.PRNGKey(0), 14)
    s = 0.1
    params = {
        "wx":   s * jax.random.normal(keys[0], (4 * C, Cin, K, K), jnp.float32),
        "bx":   s * jax.random.normal(keys[1], (4 * C,), jnp.float32),
        "wy":   s * jax.random.normal(keys[2], (3 * C, C, K, K), jnp.float32),
        "by":   s * jax.random.normal(keys[3], (3 * C,), jnp.float32),
        "wz":   s * jax.random.normal(keys[4], (C, C, K, K), jnp.float32),
        "bz":   s * jax.random.normal(keys[5], (C,), jnp.float32),
        "w_z1": s * jax.random.normal(keys[6], (C, H, W), jnp.float32),
        "w_z2": s * jax.random.normal(keys[7], (C, H, W), jnp.float32),
    }
    x = jax.random.normal(keys[8], (N, Cin, H, W), jnp.float32)
    y = jax.random.normal(keys[9], (N, C, H, W), jnp.float32)
    z = jax.random.normal(keys[10], (N, C, H, W), jnp.float32)

    fwd = jax.jit(conv_lem_cell_pallas,
                  static_argnames=("dt", "kernel_size", "padding",
                                   "activation", "matmul_dtype"))

    y_ref, z_ref = conv_lem_cell_ref(x, y, z, params, dt=dt, padding=p,
                                     activation="tanh")

    # exact path: f32 MXU operands -> tight tolerance vs reference
    y32, z32 = fwd(x, y, z, params, dt=dt, kernel_size=K, padding=p,
                   activation="tanh", matmul_dtype=jnp.float32)
    jax.block_until_ready((y32, z32))
    assert y32.shape == (N, C, H, W) and z32.shape == (N, C, H, W)
    assert jnp.allclose(y32, y_ref, atol=1e-4, rtol=1e-4)
    assert jnp.allclose(z32, z_ref, atol=1e-4, rtol=1e-4)

    # perf path (default): bf16 MXU operands, f32 accumulation / f32 gate math
    ybf, zbf = fwd(x, y, z, params, dt=dt, kernel_size=K, padding=p,
                   activation="tanh")
    jax.block_until_ready((ybf, zbf))
    assert jnp.allclose(ybf, y_ref, atol=5e-2, rtol=5e-2)
    assert jnp.allclose(zbf, z_ref, atol=5e-2, rtol=5e-2)

    # batch-blocked path (NB > 1, cross-item row masking active), exact check
    N2 = 8
    x8 = jax.random.normal(keys[11], (N2, Cin, H, W), jnp.float32)
    y8 = jax.random.normal(keys[12], (N2, C, H, W), jnp.float32)
    z8 = jax.random.normal(keys[13], (N2, C, H, W), jnp.float32)
    y8_ref, z8_ref = conv_lem_cell_ref(x8, y8, z8, params, dt=dt, padding=p,
                                       activation="tanh")
    y8o, z8o = fwd(x8, y8, z8, params, dt=dt, kernel_size=K, padding=p,
                   activation="tanh", matmul_dtype=jnp.float32)
    jax.block_until_ready((y8o, z8o))
    assert jnp.allclose(y8o, y8_ref, atol=1e-4, rtol=1e-4)
    assert jnp.allclose(z8o, z8_ref, atol=1e-4, rtol=1e-4)

    print("KERNEL_OK")
</pallas_src>

<mosaic_0001>
module attributes {stable_mosaic.version = 11 : i64} {
  func.func @kernel(%arg0: i32, %arg1: memref<16x192xf32, #tpu.memory_space<vmem>>, %arg2: memref<16x128xf32, #tpu.memory_space<vmem>>, %arg3: memref<3x192x512xf32, #tpu.memory_space<vmem>>, %arg4: memref<1x512xf32, #tpu.memory_space<vmem>>, %arg5: memref<3x128x128xf32, #tpu.memory_space<vmem>>, %arg6: memref<1x128xf32, #tpu.memory_space<vmem>>, %arg7: memref<16x128xf32, #tpu.memory_space<vmem>>, %arg8: memref<16x128xf32, #tpu.memory_space<vmem>>, %arg9: memref<16x128xf32, #tpu.memory_space<vmem>>, %arg10: memref<16x128xf32, #tpu.memory_space<vmem>>, %arg11: memref<33x192xf32, #tpu.memory_space<vmem>>, %arg12: memref<33x128xf32, #tpu.memory_space<vmem>>, %arg13: memref<16x512xf32, #tpu.memory_space<vmem>>) attributes {dimension_semantics = [#tpu.dimension_semantics<parallel>], iteration_bounds = array<i64: 2>, scalar_prefetch = 0 : i64, scratch_operands = 3 : i64, tpu.core_type = #tpu.core_type<tc>, window_params = [{transform_indices = @transform_0, window_bounds = array<i64: 16, 192>}, {transform_indices = @transform_1, window_bounds = array<i64: 16, 128>}, {pipeline_mode = #tpu.pipeline_mode<synchronous>, transform_indices = @transform_2, window_bounds = array<i64: 3, 192, 512>}, {pipeline_mode = #tpu.pipeline_mode<synchronous>, transform_indices = @transform_3, window_bounds = array<i64: 1, 512>}, {pipeline_mode = #tpu.pipeline_mode<synchronous>, transform_indices = @transform_4, window_bounds = array<i64: 3, 128, 128>}, {pipeline_mode = #tpu.pipeline_mode<synchronous>, transform_indices = @transform_5, window_bounds = array<i64: 1, 128>}, {pipeline_mode = #tpu.pipeline_mode<synchronous>, transform_indices = @transform_6, window_bounds = array<i64: 16, 128>}, {pipeline_mode = #tpu.pipeline_mode<synchronous>, transform_indices = @transform_7, window_bounds = array<i64: 16, 128>}, {transform_indices = @transform_8, window_bounds = array<i64: 16, 128>}, {transform_indices = @transform_9, window_bounds = array<i64: 16, 128>}]} {
    %cst = arith.constant 0.000000e+00 : f32
    %0 = vector.broadcast %cst : f32 to vector<1x192xf32>
    %c15 = arith.constant 15 : index
    %c0 = arith.constant 0 : index
    %1 = vector.load %arg11[%c15, %c0] : memref<33x192xf32, #tpu.memory_space<vmem>>, vector<1x192xf32>
    tpu.vector_store %arg11[%c15, %c0], %0 {strides = array<i32>} : memref<33x192xf32, #tpu.memory_space<vmem>>, vector<1x192xf32>,
    %cst_0 = arith.constant 0.000000e+00 : f32
    %2 = vector.broadcast %cst_0 : f32 to vector<1x192xf32>
    %c32 = arith.constant 32 : index
    %c0_1 = arith.constant 0 : index
    %3 = vector.load %arg11[%c32, %c0_1] : memref<33x192xf32, #tpu.memory_space<vmem>>, vector<1x192xf32>
    tpu.vector_store %arg11[%c32, %c0_1], %2 {strides = array<i32>} : memref<33x192xf32, #tpu.memory_space<vmem>>, vector<1x192xf32>,
    %cst_2 = arith.constant 0.000000e+00 : f32
    %4 = vector.broadcast %cst_2 : f32 to vector<1x128xf32>
    %c15_3 = arith.constant 15 : index
    %c0_4 = arith.constant 0 : index
    %5 = vector.load %arg12[%c15_3, %c0_4] : memref<33x128xf32, #tpu.memory_space<vmem>>, vector<1x128xf32>
    tpu.vector_store %arg12[%c15_3, %c0_4], %4 {strides = array<i32>} : memref<33x128xf32, #tpu.memory_space<vmem>>, vector<1x128xf32>,
    %cst_5 = arith.constant 0.000000e+00 : f32
    %6 = vector.broadcast %cst_5 : f32 to vector<1x128xf32>
    %c32_6 = arith.constant 32 : index
    %c0_7 = arith.constant 0 : index
    %7 = vector.load %arg12[%c32_6, %c0_7] : memref<33x128xf32, #tpu.memory_space<vmem>>, vector<1x128xf32>
    tpu.vector_store %arg12[%c32_6, %c0_7], %6 {strides = array<i32>} : memref<33x128xf32, #tpu.memory_space<vmem>>, vector<1x128xf32>,
    %c0_8 = arith.constant 0 : index
    %c0_9 = arith.constant 0 : index
    %8 = vector.load %arg1[%c0_8, %c0_9] : memref<16x192xf32, #tpu.memory_space<vmem>>, vector<16x192xf32>
    %c16 = arith.constant 16 : index
    %c0_10 = arith.constant 0 : index
    %9 = vector.load %arg11[%c16, %c0_10] : memref<33x192xf32, #tpu.memory_space<vmem>>, vector<16x192xf32>
    tpu.vector_store %arg11[%c16, %c0_10], %8 {strides = array<i32>} : memref<33x192xf32, #tpu.memory_space<vmem>>, vector<16x192xf32>,
    %c15_11 = arith.constant 15 : index
    %c0_12 = arith.constant 0 : index
    %10 = vector.load %arg11[%c15_11, %c0_12] : memref<33x192xf32, #tpu.memory_space<vmem>>, vector<16x192xf32>
    %c0_13 = arith.constant 0 : index
    %c0_14 = arith.constant 0 : index
    %c0_15 = arith.constant 0 : index
    %11 = vector.load %arg3[%c0_13, %c0_14, %c0_15] : memref<3x192x512xf32, #tpu.memory_space<vmem>>, vector<1x192x512xf32>
    %12 = vector.shape_cast %11 : vector<1x192x512xf32> to vector<192x512xf32>
    %cst_16 = arith.constant dense<0.000000e+00> : vector<16x512xf32>
    %13 = tpu.matmul %10, %12, %cst_16 {dimension_numbers = #tpu.dot_dimension_numbers<[1], [0], [0], [1], [0, 0, 1, 1], [], []>} : vector<16x192xf32>, vector<192x512xf32>, vector<16x512xf32> -> vector<16x512xf32>
    %c0_17 = arith.constant 0 : index
    %c0_18 = arith.constant 0 : index
    %14 = vector.load %arg13[%c0_17, %c0_18] : memref<16x512xf32, #tpu.memory_space<vmem>>, vector<16x512xf32>
    tpu.vector_store %arg13[%c0_17, %c0_18], %13 {strides = array<i32>} : memref<16x512xf32, #tpu.memory_space<vmem>>, vector<16x512xf32>,
    %c16_19 = arith.constant 16 : index
    %c0_20 = arith.constant 0 : index
    %15 = vector.load %arg11[%c16_19, %c0_20] : memref<33x192xf32, #tpu.memory_space<vmem>>, vector<16x192xf32>
    %c1 = arith.constant 1 : index
    %c0_21 = arith.constant 0 : index
    %c0_22 = arith.constant 0 : index
    %16 = vector.load %arg3[%c1, %c0_21, %c0_22] : memref<3x192x512xf32, #tpu.memory_space<vmem>>, vector<1x192x512xf32>
    %17 = vector.shape_cast %16 : vector<1x192x512xf32> to vector<192x512xf32>
    %cst_23 = arith.constant dense<0.000000e+00> : vector<16x512xf32>
    %18 = tpu.matmul %15, %17, %cst_23 {dimension_numbers = #tpu.dot_dimension_numbers<[1], [0], [0], [1], [0, 0, 1, 1], [], []>} : vector<16x192xf32>, vector<192x512xf32>, vector<16x512xf32> -> vector<16x512xf32>
    %c0_24 = arith.constant 0 : index
    %c0_25 = arith.constant 0 : index
    %19 = vector.load %arg13[%c0_24, %c0_25] : memref<16x512xf32, #tpu.memory_space<vmem>>, vector<16x512xf32>
    %20 = arith.addf %19, %18 : vector<16x512xf32>
    %c0_26 = arith.constant 0 : index
    %c0_27 = arith.constant 0 : index
    %21 = vector.load %arg13[%c0_26, %c0_27] : memref<16x512xf32, #tpu.memory_space<vmem>>, vector<16x512xf32>
    tpu.vector_store %arg13[%c0_26, %c0_27], %20 {strides = array<i32>} : memref<16x512xf32, #tpu.memory_space<vmem>>, vector<16x512xf32>,
    %c17 = arith.constant 17 : index
    %c0_28 = arith.constant 0 : index
    %22 = vector.load %arg11[%c17, %c0_28] : memref<33x192xf32, #tpu.memory_space<vmem>>, vector<16x192xf32>
    %c2 = arith.constant 2 : index
    %c0_29 = arith.constant 0 : index
    %c0_30 = arith.constant 0 : index
    %23 = vector.load %arg3[%c2, %c0_29, %c0_30] : memref<3x192x512xf32, #tpu.memory_space<vmem>>, vector<1x192x512xf32>
    %24 = vector.shape_cast %23 : vector<1x192x512xf32> to vector<192x512xf32>
    %cst_31 = arith.constant dense<0.000000e+00> : vector<16x512xf32>
    %25 = tpu.matmul %22, %24, %cst_31 {dimension_numbers = #tpu.dot_dimension_numbers<[1], [0], [0], [1], [0, 0, 1, 1], [], []>} : vector<16x192xf32>, vector<192x512xf32>, vector<16x512xf32> -> vector<16x512xf32>
    %c0_32 = arith.constant 0 : index
    %c0_33 = arith.constant 0 : index
    %26 = vector.load %arg13[%c0_32, %c0_33] : memref<16x512xf32, #tpu.memory_space<vmem>>, vector<16x512xf32>
    %27 = arith.addf %26, %25 : vector<16x512xf32>
    %c0_34 = arith.constant 0 : index
    %c0_35 = arith.constant 0 : index
    %28 = vector.load %arg13[%c0_34, %c0_35] : memref<16x512xf32, #tpu.memory_space<vmem>>, vector<16x512xf32>
    tpu.vector_store %arg13[%c0_34, %c0_35], %27 {strides = array<i32>} : memref<16x512xf32, #tpu.memory_space<vmem>>, vector<16x512xf32>,
    %c0_36 = arith.constant 0 : index
    %c0_37 = arith.constant 0 : index
    %29 = vector.load %arg2[%c0_36, %c0_37] : memref<16x128xf32, #tpu.memory_space<vmem>>, vector<16x128xf32>
    %c0_38 = arith.constant 0 : index
    %c128 = arith.constant 128 : index
    %30 = vector.load %arg13[%c0_38, %c128] : memref<16x512xf32, #tpu.memory_space<vmem>>, vector<16x128xf32>
    %c0_39 = arith.constant 0 : index
    %c128_40 = arith.constant 128 : index
    %31 = vector.load %arg4[%c0_39, %c128_40] : memref<1x512xf32, #tpu.memory_space<vmem>>, vector<1x128xf32>
    %32 = vector.broadcast %31 : vector<1x128xf32> to vector<16x128xf32>
    %33 = arith.addf %30, %32 : vector<16x128xf32>
    %c0_41 = arith.constant 0 : index
    %c384 = arith.constant 384 : index
    %34 = vector.load %arg13[%c0_41, %c384] : memref<16x512xf32, #tpu.memory_space<vmem>>, vector<16x128xf32>
    %c0_42 = arith.constant 0 : index
    %c384_43 = arith.constant 384 : index
    %35 = vector.load %arg4[%c0_42, %c384_43] : memref<1x512xf32, #tpu.memory_space<vmem>>, vector<1x128xf32>
    %36 = vector.broadcast %35 : vector<1x128xf32> to vector<16x128xf32>
    %37 = arith.addf %34, %36 : vector<16x128xf32>
    %c0_44 = arith.constant 0 : index
    %c0_45 = arith.constant 0 : index
    %38 = vector.load %arg8[%c0_44, %c0_45] : memref<16x128xf32, #tpu.memory_space<vmem>>, vector<16x128xf32>
    %39 = arith.mulf %38, %29 : vector<16x128xf32>
    %40 = arith.addf %33, %39 : vector<16x128xf32>
    %41 = arith.negf %40 : vector<16x128xf32>
    %42 = math.exp %41 : vector<16x128xf32>
    %cst_46 = arith.constant 1.000000e+00 : f32
    %43 = vector.broadcast %cst_46 : f32 to vector<16x128xf32>
    %44 = arith.addf %43, %42 : vector<16x128xf32>
    %45 = arith.divf %43, %44 : vector<16x128xf32>
    %cst_47 = arith.constant 1.000000e+00 : f32
    %46 = vector.broadcast %cst_47 : f32 to vector<16x128xf32>
    %47 = arith.mulf %46, %45 : vector<16x128xf32>
    %cst_48 = arith.constant 1.000000e+00 : f32
    %48 = vector.broadcast %cst_48 : f32 to vector<16x128xf32>
    %49 = arith.subf %48, %47 : vector<16x128xf32>
    %50 = arith.mulf %49, %29 : vector<16x128xf32>
    %51 = math.tanh %37 : vector<16x128xf32>
    %52 = arith.mulf %47, %51 : vector<16x128xf32>
    %53 = arith.addf %50, %52 : vector<16x128xf32>
    %c0_49 = arith.constant 0 : index
    %c0_50 = arith.constant 0 : index
    %54 = vector.load %arg10[%c0_49, %c0_50] : memref<16x128xf32, #tpu.memory_space<vmem>>, vector<16x128xf32>
    tpu.vector_store %arg10[%c0_49, %c0_50], %53 {strides = array<i32>} : memref<16x128xf32, #tpu.memory_space<vmem>>, vector<16x128xf32>,
    %c16_51 = arith.constant 16 : index
    %c0_52 = arith.constant 0 : index
    %55 = vector.load %arg12[%c16_51, %c0_52] : memref<33x128xf32, #tpu.memory_space<vmem>>, vector<16x128xf32>
    tpu.vector_store %arg12[%c16_51, %c0_52], %53 {strides = array<i32>} : memref<33x128xf32, #tpu.memory_space<vmem>>, vector<16x128xf32>,
    %c0_53 = arith.constant 0 : index
    %c256 = arith.constant 256 : index
    %56 = vector.load %arg13[%c0_53, %c256] : memref<16x512xf32, #tpu.memory_space<vmem>>, vector<16x128xf32>
    %c15_54 = arith.constant 15 : index
    %c0_55 = arith.constant 0 : index
    %57 = vector.load %arg12[%c15_54, %c0_55] : memref<33x128xf32, #tpu.memory_space<vmem>>, vector<16x128xf32>
    %c0_56 = arith.constant 0 : index
    %c0_57 = arith.constant 0 : index
    %c0_58 = arith.constant 0 : index
    %58 = vector.load %arg5[%c0_56, %c0_57, %c0_58] : memref<3x128x128xf32, #tpu.memory_space<vmem>>, vector<1x128x128xf32>
    %59 = vector.shape_cast %58 : vector<1x128x128xf32> to vector<128x128xf32>
    %cst_59 = arith.constant dense<0.000000e+00> : vector<16x128xf32>
    %60 = tpu.matmul %57, %59, %cst_59 {dimension_numbers = #tpu.dot_dimension_numbers<[1], [0], [0], [1], [0, 0, 1, 1], [], []>} : vector<16x128xf32>, vector<128x128xf32>, vector<16x128xf32> -> vector<16x128xf32>
    %61 = arith.addf %56, %60 : vector<16x128xf32>
    %c0_60 = arith.constant 0 : index
    %c256_61 = arith.constant 256 : index
    %62 = vector.load %arg13[%c0_60, %c256_61] : memref<16x512xf32, #tpu.memory_space<vmem>>, vector<16x128xf32>
    tpu.vector_store %arg13[%c0_60, %c256_61], %61 {strides = array<i32>} : memref<16x512xf32, #tpu.memory_space<vmem>>, vector<16x128xf32>,
    %c0_62 = arith.constant 0 : index
    %c256_63 = arith.constant 256 : index
    %63 = vector.load %arg13[%c0_62, %c256_63] : memref<16x512xf32, #tpu.memory_space<vmem>>, vector<16x128xf32>
    %c16_64 = arith.constant 16 : index
    %c0_65 = arith.constant 0 : index
    %64 = vector.load %arg12[%c16_64, %c0_65] : memref<33x128xf32, #tpu.memory_space<vmem>>, vector<16x128xf32>
    %c1_66 = arith.constant 1 : index
    %c0_67 = arith.constant 0 : index
    %c0_68 = arith.constant 0 : index
    %65 = vector.load %arg5[%c1_66, %c0_67, %c0_68] : memref<3x128x128xf32, #tpu.memory_space<vmem>>, vector<1x128x128xf32>
    %66 = vector.shape_cast %65 : vector<1x128x128xf32> to vector<128x128xf32>
    %cst_69 = arith.constant dense<0.000000e+00> : vector<16x128xf32>
    %67 = tpu.matmul %64, %66, %cst_69 {dimension_numbers = #tpu.dot_dimension_numbers<[1], [0], [0], [1], [0, 0, 1, 1], [], []>} : vector<16x128xf32>, vector<128x128xf32>, vector<16x128xf32> -> vector<16x128xf32>
    %68 = arith.addf %63, %67 : vector<16x128xf32>
    %c0_70 = arith.constant 0 : index
    %c256_71 = arith.constant 256 : index
    %69 = vector.load %arg13[%c0_70, %c256_71] : memref<16x512xf32, #tpu.memory_space<vmem>>, vector<16x128xf32>
    tpu.vector_store %arg13[%c0_70, %c256_71], %68 {strides = array<i32>} : memref<16x512xf32, #tpu.memory_space<vmem>>, vector<16x128xf32>,
    %c0_72 = arith.constant 0 : index
    %c256_73 = arith.constant 256 : index
    %70 = vector.load %arg13[%c0_72, %c256_73] : memref<16x512xf32, #tpu.memory_space<vmem>>, vector<16x128xf32>
    %c17_74 = arith.constant 17 : index
    %c0_75 = arith.constant 0 : index
    %71 = vector.load %arg12[%c17_74, %c0_75] : memref<33x128xf32, #tpu.memory_space<vmem>>, vector<16x128xf32>
    %c2_76 = arith.constant 2 : index
    %c0_77 = arith.constant 0 : index
    %c0_78 = arith.constant 0 : index
    %72 = vector.load %arg5[%c2_76, %c0_77, %c0_78] : memref<3x128x128xf32, #tpu.memory_space<vmem>>, vector<1x128x128xf32>
    %73 = vector.shape_cast %72 : vector<1x128x128xf32> to vector<128x128xf32>
    %cst_79 = arith.constant dense<0.000000e+00> : vector<16x128xf32>
    %74 = tpu.matmul %71, %73, %cst_79 {dimension_numbers = #tpu.dot_dimension_numbers<[1], [0], [0], [1], [0, 0, 1, 1], [], []>} : vector<16x128xf32>, vector<128x128xf32>, vector<16x128xf32> -> vector<16x128xf32>
    %75 = arith.addf %70, %74 : vector<16x128xf32>
    %c0_80 = arith.constant 0 : index
    %c256_81 = arith.constant 256 : index
    %76 = vector.load %arg13[%c0_80, %c256_81] : memref<16x512xf32, #tpu.memory_space<vmem>>, vector<16x128xf32>
    tpu.vector_store %arg13[%c0_80, %c256_81], %75 {strides = array<i32>} : memref<16x512xf32, #tpu.memory_space<vmem>>, vector<16x128xf32>,
    %c0_82 = arith.constant 0 : index
    %c0_83 = arith.constant 0 : index
    %77 = vector.load %arg1[%c0_82, %c0_83] : memref<16x192xf32, #tpu.memory_space<vmem>>, vector<16x128xf32>
    %c0_84 = arith.constant 0 : index
    %c0_85 = arith.constant 0 : index
    %78 = vector.load %arg10[%c0_84, %c0_85] : memref<16x128xf32, #tpu.memory_space<vmem>>, vector<16x128xf32>
    %c0_86 = arith.constant 0 : index
    %c0_87 = arith.constant 0 : index
    %79 = vector.load %arg13[%c0_86, %c0_87] : memref<16x512xf32, #tpu.memory_space<vmem>>, vector<16x128xf32>
    %c0_88 = arith.constant 0 : index
    %c0_89 = arith.constant 0 : index
    %80 = vector.load %arg4[%c0_88, %c0_89] : memref<1x512xf32, #tpu.memory_space<vmem>>, vector<1x128xf32>
    %81 = vector.broadcast %80 : vector<1x128xf32> to vector<16x128xf32>
    %82 = arith.addf %79, %81 : vector<16x128xf32>
    %c0_90 = arith.constant 0 : index
    %c256_91 = arith.constant 256 : index
    %83 = vector.load %arg13[%c0_90, %c256_91] : memref<16x512xf32, #tpu.memory_space<vmem>>, vector<16x128xf32>
    %c0_92 = arith.constant 0 : index
    %c256_93 = arith.constant 256 : index
    %84 = vector.load %arg4[%c0_92, %c256_93] : memref<1x512xf32, #tpu.memory_space<vmem>>, vector<1x128xf32>
    %85 = vector.broadcast %84 : vector<1x128xf32> to vector<16x128xf32>
    %86 = arith.addf %83, %85 : vector<16x128xf32>
    %c0_94 = arith.constant 0 : index
    %c0_95 = arith.constant 0 : index
    %87 = vector.load %arg6[%c0_94, %c0_95] : memref<1x128xf32, #tpu.memory_space<vmem>>, vector<1x128xf32>
    %88 = vector.broadcast %87 : vector<1x128xf32> to vector<16x128xf32>
    %89 = arith.addf %86, %88 : vector<16x128xf32>
    %c0_96 = arith.constant 0 : index
    %c0_97 = arith.constant 0 : index
    %90 = vector.load %arg7[%c0_96, %c0_97] : memref<16x128xf32, #tpu.memory_space<vmem>>, vector<16x128xf32>
    %91 = arith.mulf %90, %78 : vector<16x128xf32>
    %92 = arith.addf %82, %91 : vector<16x128xf32>
    %93 = arith.negf %92 : vector<16x128xf32>
    %94 = math.exp %93 : vector<16x128xf32>
    %cst_98 = arith.constant 1.000000e+00 : f32
    %95 = vector.broadcast %cst_98 : f32 to vector<16x128xf32>
    %96 = arith.addf %95, %94 : vector<16x128xf32>
    %97 = arith.divf %95, %96 : vector<16x128xf32>
    %cst_99 = arith.constant 1.000000e+00 : f32
    %98 = vector.broadcast %cst_99 : f32 to vector<16x128xf32>
    %99 = arith.mulf %98, %97 : vector<16x128xf32>
    %cst_100 = arith.constant 1.000000e+00 : f32
    %100 = vector.broadcast %cst_100 : f32 to vector<16x128xf32>
    %101 = arith.subf %100, %99 : vector<16x128xf32>
    %102 = arith.mulf %101, %77 : vector<16x128xf32>
    %103 = math.tanh %89 : vector<16x128xf32>
    %104 = arith.mulf %99, %103 : vector<16x128xf32>
    %105 = arith.addf %102, %104 : vector<16x128xf32>
    %c0_101 = arith.constant 0 : index
    %c0_102 = arith.constant 0 : index
    %106 = vector.load %arg9[%c0_101, %c0_102] : memref<16x128xf32, #tpu.memory_space<vmem>>, vector<16x128xf32>
    tpu.vector_store %arg9[%c0_101, %c0_102], %105 {strides = array<i32>} : memref<16x128xf32, #tpu.memory_space<vmem>>, vector<16x128xf32>,
    return
  }
  func.func @transform_0(%arg0: i32) -> (i32, i32) {
    %c0_i32 = arith.constant 0 : i32
    %c0_i32_0 = arith.constant 0 : i32
    return %arg0, %c0_i32 : i32, i32
  }
  func.func @transform_1(%arg0: i32) -> (i32, i32) {
    %c0_i32 = arith.constant 0 : i32
    %c0_i32_0 = arith.constant 0 : i32
    return %arg0, %c0_i32 : i32, i32
  }
  func.func @transform_2(%arg0: i32) -> (i32, i32, i32) {
    %c0_i32 = arith.constant 0 : i32
    %c0_i32_0 = arith.constant 0 : i32
    %c0_i32_1 = arith.constant 0 : i32
    %c0_i32_2 = arith.constant 0 : i32
    return %c0_i32, %c0_i32_0, %c0_i32_1 : i32, i32, i32
  }
  func.func @transform_3(%arg0: i32) -> (i32, i32) {
    %c0_i32 = arith.constant 0 : i32
    %c0_i32_0 = arith.constant 0 : i32
    %c0_i32_1 = arith.constant 0 : i32
    return %c0_i32, %c0_i32_0 : i32, i32
  }
  func.func @transform_4(%arg0: i32) -> (i32, i32, i32) {
    %c0_i32 = arith.constant 0 : i32
    %c0_i32_0 = arith.constant 0 : i32
    %c0_i32_1 = arith.constant 0 : i32
    %c0_i32_2 = arith.constant 0 : i32
    return %c0_i32, %c0_i32_0, %c0_i32_1 : i32, i32, i32
  }
  func.func @transform_5(%arg0: i32) -> (i32, i32) {
    %c0_i32 = arith.constant 0 : i32
    %c0_i32_0 = arith.constant 0 : i32
    %c0_i32_1 = arith.constant 0 : i32
    return %c0_i32, %c0_i32_0 : i32, i32
  }
  func.func @transform_6(%arg0: i32) -> (i32, i32) {
    %c0_i32 = arith.constant 0 : i32
    %c0_i32_0 = arith.constant 0 : i32
    %c0_i32_1 = arith.constant 0 : i32
    return %c0_i32, %c0_i32_0 : i32, i32
  }
  func.func @transform_7(%arg0: i32) -> (i32, i32) {
    %c0_i32 = arith.constant 0 : i32
    %c0_i32_0 = arith.constant 0 : i32
    %c0_i32_1 = arith.constant 0 : i32
    return %c0_i32, %c0_i32_0 : i32, i32
  }
  func.func @transform_8(%arg0: i32) -> (i32, i32) {
    %c0_i32 = arith.constant 0 : i32
    %c0_i32_0 = arith.constant 0 : i32
    return %arg0, %c0_i32 : i32, i32
  }
  func.func @transform_9(%arg0: i32) -> (i32, i32) {
    %c0_i32 = arith.constant 0 : i32
    %c0_i32_0 = arith.constant 0 : i32
    return %arg0, %c0_i32 : i32, i32
  }
}

</mosaic_0001>

<bundles_post_ra>
// kernel: conv_lem_cell_pallas.1
= control target key start
LH: loop header
LB: loop body
LE: loop exit
PB: predicated region body
PF: predicated region fallthrough
CT: control target
= control target key end

     0   :  { %s2708_s30 = smov 0   ;;  %s3859_s0 = inlined_call_operand.vmem [shape: f32[32,192], index: 0, kind: input, shape index: {}]   ;;  %s3860_s1 = inlined_call_operand.vmem [shape: f32[32,128], index: 1, kind: input, shape index: {}]   ;;  %s3861_s2 = inlined_call_operand.vmem [shape: f32[3,192,512], index: 2, kind: input, shape index: {}]   ;;  %s3862_s3 = inlined_call_operand.vmem [shape: f32[1,512], index: 3, kind: input, shape index: {}]   ;;  %s3863_s4 = inlined_call_operand.vmem [shape: f32[3,128,128], index: 4, kind: input, shape index: {}]   ;;  %s3864_s5 = inlined_call_operand.vmem [shape: f32[1,128], index: 5, kind: input, shape index: {}]   ;;  %s3865_s6 = inlined_call_operand.vmem [shape: f32[16,128], index: 6, kind: input, shape index: {}]   ;;  %s3866_s7 = inlined_call_operand.vmem [shape: f32[16,128], index: 7, kind: input, shape index: {}]   ;;  %s3867_s8 = inlined_call_operand.vmem [shape: f32[32,128], index: 8, kind: output, shape index: {0}]   ;;  %s3868_s9 = inlined_call_operand.vmem [shape: f32[32,128], index: 9, kind: output, shape index: {1}]  }
   0x1 LB: > { %s1794_s10 = sadd.s32 4294967295, %s2655_s30   ;;  %p1798_p0 = scmp.ge.s32.totalorder %s2655_s30, 1  ;;  %s2655_s30 = sphi %s2708_s30, %s20_s30  }
   0x2   : > { %p303_p1 = scmp.lt.s32.totalorder %s2655_s30, 3 }
   0x4   : > { %p304_p2 = pnand %p1798_p0, %p303_p1 }
   0x5   : > { %v403_v0 = vld [vmem:[%s3861_s2 + $0x8] sm:$0xff] (!%p304_p2)  ;;  %v405_v2 = vld [vmem:[%s3861_s2 + $0x18] sm:$0xff] (!%p304_p2)  ;;  %v375_v3 = vlaneseq (!%p304_p2)  ;;  %v402_v6 = vld [vmem:[%s3861_s2] sm:$0xff] (!%p304_p2)  ;;  %v2657_v8 = vmov (!%p304_p2), 0.0   ;;  %s2850_s23 = sshll.u32 (!%p304_p2), %s1794_s10, 1  ;;  %vm392_vm1 = vcmask (!%p304_p2), 523264  }
   0x6   : > { %307 = sbr.rel (%p304_p2) target bundleno = 681 (0x2a9), region = 52  ;;  %v407_v1 = vld [vmem:[%s3861_s2 + $0x28] sm:$0xff] (!%p304_p2)  ;;  %v409_v5 = vld [vmem:[%s3861_s2 + $0x38] sm:$0xff] (!%p304_p2)  ;;  %v406_v7 = vld [vmem:[%s3861_s2 + $0x20] sm:$0xff] (!%p304_p2)  ;;  %385 = vst [vmem:[#allocation3 + $0xf] sm:$0x1] (!%p304_p2), %v2657_v8 }
   0x7   : > { %v2215_v4 = vpack.c.bf16 (!%p304_p2), %v407_v1, %v403_v0  ;;  %386 = vst [vmem:[#allocation3 + $0x20] sm:$0x1] (!%p304_p2), %v2657_v8  ;;  %v2263_v9 = vpack.c.bf16 (!%p304_p2), %v409_v5, %v405_v2  ;;  %v2217_v10 = vpack.c.bf16 (!%p304_p2), %v406_v7, %v402_v6  ;;  %v404_v11 = vld [vmem:[%s3861_s2 + $0x10] sm:$0xff] (!%p304_p2)  ;;  %v411_v13 = vld [vmem:[%s3861_s2 + $0x48] sm:$0xff] (!%p304_p2)  ;;  %vm377_vm0 = vcmp.lt.s32.totalorder (!%p304_p2), %v375_v3, 192  ;;  %v413_v16 = vld [vmem:[%s3861_s2 + $0x58] sm:$0xff] (!%p304_p2) }
   0x8   : > { %v408_v12 = vld [vmem:[%s3861_s2 + $0x30] sm:$0xff] (!%p304_p2)  ;;  %v415_v15 = vld [vmem:[%s3861_s2 + $0x68] sm:$0xff] (!%p304_p2)  ;;  %v417_v17 = vld [vmem:[%s3861_s2 + $0x78] sm:$0xff] (!%p304_p2)  ;;  %380 = vst.msk [vmem:[#allocation2 + $0x17] ss:$8 sm:$0x3] (!%p304_p2), %vm377_vm0, %v2657_v8 }
   0x9   : > { %2216 = vmatprep.subr.bf16.mxu0 (!%p304_p2), %v2215_v4  ;;  %v2265_v14 = vpack.c.bf16 (!%p304_p2), %v408_v12, %v404_v11  ;;  %383 = vst.msk [vmem:[#allocation2 + $0x40] ss:$8 sm:$0x3] (!%p304_p2), %vm377_vm0, %v2657_v8  ;;  %2264 = vmatprep.subr.bf16.mxu1 (!%p304_p2), %v2263_v9  ;;  %v2219_v18 = vpack.c.bf16 (!%p304_p2), %v415_v15, %v411_v13  ;;  %v410_v20 = vld [vmem:[%s3861_s2 + $0x40] sm:$0xff] (!%p304_p2)  ;;  %v412_v22 = vld [vmem:[%s3861_s2 + $0x50] sm:$0xff] (!%p304_p2)  ;;  %v419_v25 = vld [vmem:[%s3861_s2 + $0x88] sm:$0xff] (!%p304_p2) }
   0xa   : > { %2218 = vmatpush1.bf16.msra.mxu0 (!%p304_p2), %v2217_v10  ;;  %v2267_v19 = vpack.c.bf16 (!%p304_p2), %v417_v17, %v413_v16  ;;  %v414_v21 = vld [vmem:[%s3861_s2 + $0x60] sm:$0xff] (!%p304_p2)  ;;  %v416_v24 = vld [vmem:[%s3861_s2 + $0x70] sm:$0xff] (!%p304_p2)  ;;  %v423_v26 = vld [vmem:[%s3861_s2 + $0xa8] sm:$0xff] (!%p304_p2)  ;;  %p351_p3 = scmp.lt.s32.totalorder (!%p304_p2), %s2850_s23, 3  ;;  %vm504_vm2 = vcmask (!%p304_p2), 1040384   ;;  %vm1077_vm3 = vcmask (!%p304_p2), 1046528  }
   0xb   : > { %2266 = vmatpush1.bf16.msra.mxu1 (!%p304_p2), %v2265_v14  ;;  %v2221_v23 = vpack.c.bf16 (!%p304_p2), %v414_v21, %v410_v20  ;;  %2220 = vmatprep.subr.bf16.mxu0 (!%p304_p2), %v2219_v18  ;;  %v2269_v27 = vpack.c.bf16 (!%p304_p2), %v416_v24, %v412_v22  ;;  %v2223_v28 = vpack.c.bf16 (!%p304_p2), %v423_v26, %v419_v25  ;;  %v421_v29 = vld [vmem:[%s3861_s2 + $0x98] sm:$0xff] (!%p304_p2)  ;;  %v418_v31 = vld [vmem:[%s3861_s2 + $0x80] sm:$0xff] (!%p304_p2)  ;;  %v420_v34 = vld [vmem:[%s3861_s2 + $0x90] sm:$0xff] (!%p304_p2) }
   0xc   : > { %2268 = vmatprep.subr.bf16.mxu1 (!%p304_p2), %v2267_v19  ;;  %v425_v30 = vld [vmem:[%s3861_s2 + $0xb8] sm:$0xff] (!%p304_p2)  ;;  %v422_v33 = vld [vmem:[%s3861_s2 + $0xa0] sm:$0xff] (!%p304_p2)  ;;  %v424_v35 = vld [vmem:[%s3861_s2 + $0xb0] sm:$0xff] (!%p304_p2) }
   0xd   : > { %v2271_v32 = vpack.c.bf16 %v425_v30, %v421_v29  ;;  %v2225_v36 = vpack.c.bf16 %v422_v33, %v418_v31  ;;  %v427_v37 = vld [vmem:[%s3861_s2 + $0xc8] sm:$0xff]  ;;  %v429_v39 = vld [vmem:[%s3861_s2 + $0xd8] sm:$0xff]  ;;  %v2273_v40 = vpack.c.bf16 %v424_v35, %v420_v34  ;;  %v426_v43 = vld [vmem:[%s3861_s2 + $0xc0] sm:$0xff]  ;;  %s3870_s23 = smov (!%p351_p3, %s2850_s23), 3 }
   0xe   : > { %2222 = vmatpush1.bf16.msra.mxu0 %v2221_v23  ;;  %v431_v38 = vld [vmem:[%s3861_s2 + $0xe8] sm:$0xff]  ;;  %v433_v42 = vld [vmem:[%s3861_s2 + $0xf8] sm:$0xff]  ;;  %v430_v44 = vld [vmem:[%s3861_s2 + $0xe0] sm:$0xff]  ;;  %s2055_s10 = sshll.u32 %s3870_s23, 4  ;;  %s3762_s21 = sshll.u32 %s3870_s23, 3 }
   0xf   : > { %2270 = vmatpush1.bf16.msra.mxu1 %v2269_v27  ;;  %2224 = vmatprep.subr.bf16.mxu0 %v2223_v28  ;;  %v2227_v41 = vpack.c.bf16 %v431_v38, %v427_v37  ;;  %v2275_v45 = vpack.c.bf16 %v433_v42, %v429_v39  ;;  %v428_v46 = vld [vmem:[%s3861_s2 + $0xd0] sm:$0xff]  ;;  %v435_v48 = vld [vmem:[%s3861_s2 + $0x108] sm:$0xff]  ;;  %v437_v50 = vld [vmem:[%s3861_s2 + $0x118] sm:$0xff]  ;;  %v2229_v52 = vpack.c.bf16 %v430_v44, %v426_v43  ;;  %s2943_s24 = scalar_lea.vmem %s3859_s0, %s2055_s10  ;;  %s361_s26 = scalar_lea.vmem %s3860_s1, %s3762_s21 }
  0x10   : > { %2272 = vmatprep.subr.bf16.mxu1 %v2271_v32  ;;  %v432_v47 = vld [vmem:[%s3861_s2 + $0xf0] sm:$0xff]  ;;  %v439_v49 = vld [vmem:[%s3861_s2 + $0x128] sm:$0xff]  ;;  %v441_v51 = vld [vmem:[%s3861_s2 + $0x138] sm:$0xff]  ;;  %s373_s16 = scalar_lea.vmem %s3868_s9, %s3762_s21  ;;  %s367_s22 = scalar_lea.vmem %s3867_s8, %s3762_s21 }
  0x11   : > { %v2277_v53 = vpack.c.bf16 %v432_v47, %v428_v46  ;;  %v2231_v54 = vpack.c.bf16 %v439_v49, %v435_v48  ;;  %v434_v55 = vld [vmem:[%s3861_s2 + $0x100] sm:$0xff]  ;;  %v436_v57 = vld [vmem:[%s3861_s2 + $0x110] sm:$0xff]  ;;  %v2279_v58 = vpack.c.bf16 %v441_v51, %v437_v50  ;;  %v443_v60 = vld [vmem:[%s3861_s2 + $0x148] sm:$0xff] }
  0x12   : > { %2226 = vmatpush1.bf16.msra.mxu0 %v2225_v36  ;;  %v438_v56 = vld [vmem:[%s3861_s2 + $0x120] sm:$0xff]  ;;  %v440_v59 = vld [vmem:[%s3861_s2 + $0x130] sm:$0xff]  ;;  %v447_v61 = vld [vmem:[%s3861_s2 + $0x168] sm:$0xff] }
  0x13   : > { %2274 = vmatpush1.bf16.msra.mxu1 %v2273_v40  ;;  %2228 = vmatprep.subr.bf16.mxu0 %v2227_v41  ;;  %v445_v62 = vld [vmem:[%s3861_s2 + $0x158] sm:$0xff]  ;;  %v2233_v0 = vpack.c.bf16 %v438_v56, %v434_v55  ;;  %v2281_v1 = vpack.c.bf16 %v440_v59, %v436_v57  ;;  %v2235_v2 = vpack.c.bf16 %v447_v61, %v443_v60  ;;  %v442_v3 = vld [vmem:[%s3861_s2 + $0x140] sm:$0xff]  ;;  %v444_v5 = vld [vmem:[%s3861_s2 + $0x150] sm:$0xff] }
  0x14   : > { %2276 = vmatprep.subr.bf16.mxu1 %v2275_v45  ;;  %v449_v63 = vld [vmem:[%s3861_s2 + $0x178] sm:$0xff]  ;;  %v446_v4 = vld [vmem:[%s3861_s2 + $0x160] sm:$0xff]  ;;  %v448_v7 = vld [vmem:[%s3861_s2 + $0x170] sm:$0xff] }
  0x15   : > { %v2283_v6 = vpack.c.bf16 %v449_v63, %v445_v62  ;;  %v451_v8 = vld [vmem:[%s3861_s2 + $0x188] sm:$0xff]  ;;  %v453_v10 = vld [vmem:[%s3861_s2 + $0x198] sm:$0xff]  ;;  %v2237_v12 = vpack.c.bf16 %v446_v4, %v442_v3  ;;  %v2285_v13 = vpack.c.bf16 %v448_v7, %v444_v5  ;;  %v450_v15 = vld [vmem:[%s3861_s2 + $0x180] sm:$0xff] }
  0x16   : > { %2230 = vmatpush1.bf16.msra.mxu0 %v2229_v52  ;;  %v455_v9 = vld [vmem:[%s3861_s2 + $0x1a8] sm:$0xff]  ;;  %v457_v11 = vld [vmem:[%s3861_s2 + $0x1b8] sm:$0xff]  ;;  %v454_v16 = vld [vmem:[%s3861_s2 + $0x1a0] sm:$0xff] }
  0x17   : > { %2278 = vmatpush1.bf16.msra.mxu1 %v2277_v53  ;;  %2232 = vmatprep.subr.bf16.mxu0 %v2231_v54  ;;  %v2239_v14 = vpack.c.bf16 %v455_v9, %v451_v8  ;;  %v452_v17 = vld [vmem:[%s3861_s2 + $0x190] sm:$0xff]  ;;  %v2287_v18 = vpack.c.bf16 %v457_v11, %v453_v10  ;;  %v459_v20 = vld [vmem:[%s3861_s2 + $0x1c8] sm:$0xff]  ;;  %v461_v22 = vld [vmem:[%s3861_s2 + $0x1d8] sm:$0xff]  ;;  %v2241_v24 = vpack.c.bf16 %v454_v16, %v450_v15 }
  0x18   : > { %2280 = vmatprep.subr.bf16.mxu1 %v2279_v58  ;;  %v456_v19 = vld [vmem:[%s3861_s2 + $0x1b0] sm:$0xff]  ;;  %v463_v21 = vld [vmem:[%s3861_s2 + $0x1e8] sm:$0xff]  ;;  %v465_v23 = vld [vmem:[%s3861_s2 + $0x1f8] sm:$0xff] }
  0x19   : > { %v2289_v25 = vpack.c.bf16 %v456_v19, %v452_v17  ;;  %v2243_v26 = vpack.c.bf16 %v463_v21, %v459_v20  ;;  %v458_v27 = vld [vmem:[%s3861_s2 + $0x1c0] sm:$0xff]  ;;  %v460_v29 = vld [vmem:[%s3861_s2 + $0x1d0] sm:$0xff]  ;;  %v2291_v30 = vpack.c.bf16 %v465_v23, %v461_v22  ;;  %v467_v32 = vld [vmem:[%s3861_s2 + $0x208] sm:$0xff] }
  0x1a   : > { %2234 = vmatpush1.bf16.msra.mxu0 %v2233_v0  ;;  %v462_v28 = vld [vmem:[%s3861_s2 + $0x1e0] sm:$0xff]  ;;  %v464_v31 = vld [vmem:[%s3861_s2 + $0x1f0] sm:$0xff]  ;;  %v471_v33 = vld [vmem:[%s3861_s2 + $0x228] sm:$0xff] }
  0x1b   : > { %2282 = vmatpush1.bf16.msra.mxu1 %v2281_v1  ;;  %2236 = vmatprep.subr.bf16.mxu0 %v2235_v2  ;;  %v469_v34 = vld [vmem:[%s3861_s2 + $0x218] sm:$0xff]  ;;  %v2245_v36 = vpack.c.bf16 %v462_v28, %v458_v27  ;;  %v2293_v37 = vpack.c.bf16 %v464_v31, %v460_v29  ;;  %v2247_v38 = vpack.c.bf16 %v471_v33, %v467_v32  ;;  %v466_v39 = vld [vmem:[%s3861_s2 + $0x200] sm:$0xff]  ;;  %v468_v41 = vld [vmem:[%s3861_s2 + $0x210] sm:$0xff] }
  0x1c   : > { %2284 = vmatprep.subr.bf16.mxu1 %v2283_v6  ;;  %v473_v35 = vld [vmem:[%s3861_s2 + $0x238] sm:$0xff]  ;;  %v470_v40 = vld [vmem:[%s3861_s2 + $0x220] sm:$0xff]  ;;  %v472_v43 = vld [vmem:[%s3861_s2 + $0x230] sm:$0xff] }
  0x1d   : > { %v2295_v42 = vpack.c.bf16 %v473_v35, %v469_v34  ;;  %v475_v44 = vld [vmem:[%s3861_s2 + $0x248] sm:$0xff]  ;;  %v477_v46 = vld [vmem:[%s3861_s2 + $0x258] sm:$0xff]  ;;  %v2249_v48 = vpack.c.bf16 %v470_v40, %v466_v39  ;;  %v474_v49 = vld [vmem:[%s3861_s2 + $0x240] sm:$0xff]  ;;  %v2297_v51 = vpack.c.bf16 %v472_v43, %v468_v41 }
  0x1e   : > { %2238 = vmatpush1.bf16.msra.mxu0 %v2237_v12  ;;  %v479_v45 = vld [vmem:[%s3861_s2 + $0x268] sm:$0xff]  ;;  %v481_v47 = vld [vmem:[%s3861_s2 + $0x278] sm:$0xff]  ;;  %v478_v53 = vld [vmem:[%s3861_s2 + $0x260] sm:$0xff] }
  0x1f   : > { %2286 = vmatpush1.bf16.msra.mxu1 %v2285_v13  ;;  %2240 = vmatprep.subr.bf16.mxu0 %v2239_v14  ;;  %v388_v50 = vld [vmem:[%s2943_s24 + $0x8] sm:$0xff]  ;;  %v2251_v52 = vpack.c.bf16 %v479_v45, %v475_v44  ;;  %v476_v54 = vld [vmem:[%s3861_s2 + $0x250] sm:$0xff]  ;;  %v2299_v56 = vpack.c.bf16 %v481_v47, %v477_v46  ;;  %v2981_v59 = vld [vmem:[%s2943_s24] sm:$0xff]  ;;  %v2253_v62 = vpack.c.bf16 %v478_v53, %v474_v49 }
  0x20   : > { %2288 = vmatprep.subr.bf16.mxu1 %v2287_v18  ;;  %v480_v55 = vld [vmem:[%s3861_s2 + $0x270] sm:$0xff]  ;;  %393 = vst.msk [vmem:[#allocation2 + $0x28] sm:$0xff] %vm392_vm1, %v388_v50  ;;  %v483_v57 = vld [vmem:[%s3861_s2 + $0x288] sm:$0xff]  ;;  %v485_v60 = vld [vmem:[%s3861_s2 + $0x298] sm:$0xff] }
  0x21   : > { %v487_v58 = vld [vmem:[%s3861_s2 + $0x2a8] sm:$0xff]  ;;  %v489_v61 = vld [vmem:[%s3861_s2 + $0x2b8] sm:$0xff]  ;;  %391 = vst [vmem:[#allocation2 + $0x20] sm:$0xff] %v2981_v59  ;;  %v2301_v0 = vpack.c.bf16 %v480_v55, %v476_v54  ;;  %v482_v2 = vld [vmem:[%s3861_s2 + $0x280] sm:$0xff] }
  0x22   : > { %2242 = vmatpush1.bf16.msra.mxu0 %v2241_v24  ;;  %v397_v63 = vld [vmem:[#allocation2 + $0x18] sm:$0x80]  ;;  %v2255_v1 = vpack.c.bf16 %v487_v58, %v483_v57  ;;  %v486_v3 = vld [vmem:[%s3861_s2 + $0x2a0] sm:$0xff]  ;;  %v484_v4 = vld [vmem:[%s3861_s2 + $0x290] sm:$0xff]  ;;  %v2303_v5 = vpack.c.bf16 %v489_v61, %v485_v60 }
  0x23   : > { %2290 = vmatpush1.bf16.msra.mxu1 %v2289_v25  ;;  %2244 = vmatprep.subr.bf16.mxu0 %v2243_v26  ;;  %v488_v6 = vld [vmem:[%s3861_s2 + $0x2b0] sm:$0xff]  ;;  %v491_v7 = vld [vmem:[%s3861_s2 + $0x2c8] sm:$0xff]  ;;  %v493_v9 = vld [vmem:[%s3861_s2 + $0x2d8] sm:$0xff]  ;;  %v508_v11 = vrot.slane %v397_v63, 7  ;;  %v2257_v12 = vpack.c.bf16 %v486_v3, %v482_v2 }
  0x24   : > { %2292 = vmatprep.subr.bf16.mxu1 %v2291_v30  ;;  %v495_v8 = vld [vmem:[%s3861_s2 + $0x2e8] sm:$0xff]  ;;  %v497_v10 = vld [vmem:[%s3861_s2 + $0x2f8] sm:$0xff]  ;;  %v490_v13 = vld [vmem:[%s3861_s2 + $0x2c0] sm:$0xff]  ;;  %v2305_v15 = vpack.c.bf16 %v488_v6, %v484_v4  ;;  %v506_v30 = vrot.slane %v2981_v59, 7 }
  0x25   : > { %v2259_v16 = vpack.c.bf16 %v495_v8, %v491_v7  ;;  %v494_v17 = vld [vmem:[%s3861_s2 + $0x2e0] sm:$0xff]  ;;  %v492_v18 = vld [vmem:[%s3861_s2 + $0x2d0] sm:$0xff]  ;;  %v2307_v21 = vpack.c.bf16 %v497_v10, %v493_v9  ;;  %v1813_v23 = vld [vmem:[%s3861_s2 + $0x308] sm:$0xff] }
  0x26   : > { %2246 = vmatpush1.bf16.msra.mxu0 %v2245_v36  ;;  %v396_v20 = vld [vmem:[#allocation2 + $0x10] sm:$0x80]  ;;  %v1817_v24 = vld [vmem:[%s3861_s2 + $0x328] sm:$0xff]  ;;  %v1815_v26 = vld [vmem:[%s3861_s2 + $0x318] sm:$0xff]  ;;  %v2261_v28 = vpack.c.bf16 %v494_v17, %v490_v13 }
  0x27   : > { %2294 = vmatpush1.bf16.msra.mxu1 %v2293_v37  ;;  %2248 = vmatprep.subr.bf16.mxu0 %v2247_v38  ;;  %v3017_v14 = vld [vmem:[#allocation2 + $0x28] sm:$0xff]  ;;  %v496_v22 = vld [vmem:[%s3861_s2 + $0x2f0] sm:$0xff]  ;;  %v1819_v27 = vld [vmem:[%s3861_s2 + $0x338] sm:$0xff]  ;;  %v505_v29 = vrot.slane %v396_v20, 7  ;;  %v2311_v32 = vpack.c.bf16 %v1817_v24, %v1813_v23 }
  0x28   : > { %2296 = vmatprep.subr.bf16.mxu1 %v2295_v42  ;;  %v509_v19 = vrot.slane %v3017_v14, 7  ;;  %v2309_v31 = vpack.c.bf16 %v496_v22, %v492_v18  ;;  %v1812_v33 = vld [vmem:[%s3861_s2 + $0x300] sm:$0xff]  ;;  %v1814_v35 = vld [vmem:[%s3861_s2 + $0x310] sm:$0xff]  ;;  %v2359_v36 = vpack.c.bf16 %v1819_v27, %v1815_v26  ;;  %v1821_v38 = vld [vmem:[%s3861_s2 + $0x348] sm:$0xff] }
  0x29   : > { %v1816_v34 = vld [vmem:[%s3861_s2 + $0x320] sm:$0xff]  ;;  %v1818_v37 = vld [vmem:[%s3861_s2 + $0x330] sm:$0xff]  ;;  %v1825_v39 = vld [vmem:[%s3861_s2 + $0x368] sm:$0xff]  ;;  %v507_v42 = vsel %vm504_vm2, %v505_v29, %v506_v30 }
  0x2a   : > { %2250 = vmatpush1.bf16.msra.mxu0 %v2249_v48  ;;  %v510_v25 = vsel %vm504_vm2, %v508_v11, %v509_v19  ;;  %v1823_v40 = vld [vmem:[%s3861_s2 + $0x358] sm:$0xff]  ;;  %v2313_v43 = vpack.c.bf16 %v1816_v34, %v1812_v33  ;;  %v2361_v44 = vpack.c.bf16 %v1818_v37, %v1814_v35  ;;  %v2315_v45 = vpack.c.bf16 %v1825_v39, %v1821_v38  ;;  %v1820_v46 = vld [vmem:[%s3861_s2 + $0x340] sm:$0xff]  ;;  %v1822_v48 = vld [vmem:[%s3861_s2 + $0x350] sm:$0xff] }
  0x2b   : > { %2298 = vmatpush1.bf16.msra.mxu1 %v2297_v51  ;;  %2252 = vmatprep.subr.bf16.mxu0 %v2251_v52  ;;  %v1827_v41 = vld [vmem:[%s3861_s2 + $0x378] sm:$0xff]  ;;  %v1824_v47 = vld [vmem:[%s3861_s2 + $0x360] sm:$0xff]  ;;  %v1826_v50 = vld [vmem:[%s3861_s2 + $0x370] sm:$0xff] }
  0x2c   : > { %2300 = vmatprep.subr.bf16.mxu1 %v2299_v56  ;;  %1808 = vmatprep.mubr.msk.f32.mxu0 %vm392_vm1, %v510_v25  ;;  %v2363_v49 = vpack.c.bf16 %v1827_v41, %v1823_v40  ;;  %v1829_v51 = vld [vmem:[%s3861_s2 + $0x388] sm:$0xff]  ;;  %v1831_v53 = vld [vmem:[%s3861_s2 + $0x398] sm:$0xff]  ;;  %v2317_v55 = vpack.c.bf16 %v1824_v47, %v1820_v46  ;;  %v2365_v56 = vpack.c.bf16 %v1826_v50, %v1822_v48  ;;  %v1828_v58 = vld [vmem:[%s3861_s2 + $0x380] sm:$0xff] }
  0x2d   : > { %1810 = vmatprep.mubr.msk.f32.mxu1 %vm392_vm1, %v510_v25  ;;  %v1833_v52 = vld [vmem:[%s3861_s2 + $0x3a8] sm:$0xff]  ;;  %v1835_v54 = vld [vmem:[%s3861_s2 + $0x3b8] sm:$0xff]  ;;  %v1832_v60 = vld [vmem:[%s3861_s2 + $0x3a0] sm:$0xff] }
  0x2e   : > { %2254 = vmatpush1.bf16.msra.mxu0 %v2253_v62  ;;  %v2319_v57 = vpack.c.bf16 %v1833_v52, %v1829_v51  ;;  %v1830_v61 = vld [vmem:[%s3861_s2 + $0x390] sm:$0xff]  ;;  %v2367_v62 = vpack.c.bf16 %v1835_v54, %v1831_v53  ;;  %v1839_v2 = vld [vmem:[%s3861_s2 + $0x3d8] sm:$0xff]  ;;  %v2321_v4 = vpack.c.bf16 %v1832_v60, %v1828_v58  ;;  %v1836_v7 = vld [vmem:[%s3861_s2 + $0x3c0] sm:$0xff] }
  0x2f   : > { %2302 = vmatpush1.bf16.msra.mxu1 %v2301_v0  ;;  %2256 = vmatprep.subr.bf16.mxu0 %v2255_v1  ;;  %v1834_v63 = vld [vmem:[%s3861_s2 + $0x3b0] sm:$0xff]  ;;  %v1837_v0 = vld [vmem:[%s3861_s2 + $0x3c8] sm:$0xff]  ;;  %v1843_v3 = vld [vmem:[%s3861_s2 + $0x3f8] sm:$0xff] }
  0x30   : > { %2304 = vmatprep.subr.bf16.mxu1 %v2303_v5  ;;  %v1841_v1 = vld [vmem:[%s3861_s2 + $0x3e8] sm:$0xff]  ;;  %v2369_v5 = vpack.c.bf16 %v1834_v63, %v1830_v61  ;;  %v1840_v8 = vld [vmem:[%s3861_s2 + $0x3e0] sm:$0xff]  ;;  %v1838_v9 = vld [vmem:[%s3861_s2 + $0x3d0] sm:$0xff]  ;;  %v2371_v10 = vpack.c.bf16 %v1843_v3, %v1839_v2 }
  0x31   : > { %v2323_v6 = vpack.c.bf16 %v1841_v1, %v1837_v0  ;;  %v1842_v11 = vld [vmem:[%s3861_s2 + $0x3f0] sm:$0xff]  ;;  %v1849_v13 = vld [vmem:[%s3861_s2 + $0x428] sm:$0xff]  ;;  %v2325_v17 = vpack.c.bf16 %v1840_v8, %v1836_v7  ;;  %v1848_v22 = vld [vmem:[%s3861_s2 + $0x420] sm:$0xff] }
  0x32   : > { %2258 = vmatpush1.bf16.msra.mxu0 %v2257_v12  ;;  %v1845_v12 = vld [vmem:[%s3861_s2 + $0x408] sm:$0xff]  ;;  %v2373_v18 = vpack.c.bf16 %v1842_v11, %v1838_v9  ;;  %v1846_v23 = vld [vmem:[%s3861_s2 + $0x410] sm:$0xff]  ;;  %v1859_v29 = vld [vmem:[%s3861_s2 + $0x478] sm:$0xff] }
  0x33   : > { %2306 = vmatpush1.bf16.msra.mxu1 %v2305_v15  ;;  %2260 = vmatprep.subr.bf16.mxu0 %v2259_v16  ;;  %v1847_v15 = vld [vmem:[%s3861_s2 + $0x418] sm:$0xff]  ;;  %v2327_v20 = vpack.c.bf16 %v1849_v13, %v1845_v12  ;;  %v1850_v25 = vld [vmem:[%s3861_s2 + $0x430] sm:$0xff]  ;;  %v1853_v26 = vld [vmem:[%s3861_s2 + $0x448] sm:$0xff] }
  0x34   : > { %2308 = vmatprep.subr.bf16.mxu1 %v2307_v21  ;;  %v1851_v16 = vld [vmem:[%s3861_s2 + $0x438] sm:$0xff]  ;;  %v1844_v21 = vld [vmem:[%s3861_s2 + $0x400] sm:$0xff]  ;;  %v1857_v27 = vld [vmem:[%s3861_s2 + $0x468] sm:$0xff]  ;;  %v2377_v34 = vpack.c.bf16 %v1850_v25, %v1846_v23 }
  0x35   : > { %v2375_v24 = vpack.c.bf16 %v1851_v16, %v1847_v15  ;;  %v3173_v33 = vld [vmem:[%s2943_s24 + $0x10] sm:$0xff]  ;;  %v2331_v35 = vpack.c.bf16 %v1857_v27, %v1853_v26  ;;  %v1856_v37 = vld [vmem:[%s3861_s2 + $0x460] sm:$0xff]  ;;  %v1861_v41 = vld [vmem:[%s3861_s2 + $0x488] sm:$0xff] }
  0x36   : > { %2262 = vmatpush1.bf16.msra.mxu0 %v2261_v28  ;;  %v1855_v28 = vld [vmem:[%s3861_s2 + $0x458] sm:$0xff]  ;;  %v1854_v38 = vld [vmem:[%s3861_s2 + $0x450] sm:$0xff]  ;;  %394 = vst [vmem:[#allocation2 + $0x30] sm:$0xff] %v3173_v33  ;;  %v1860_v48 = vld [vmem:[%s3861_s2 + $0x480] sm:$0xff] }
  0x37   : > { %2310 = vmatpush1.bf16.msra.mxu1 %v2309_v31  ;;  %2312 = vmatprep.subr.bf16.mxu0 %v2311_v32  ;;  %v390_v31 = vld [vmem:[%s2943_s24 + $0x18] sm:$0xff]  ;;  %v2329_v32 = vpack.c.bf16 %v1848_v22, %v1844_v21  ;;  %v2379_v39 = vpack.c.bf16 %v1859_v29, %v1855_v28  ;;  %v1858_v40 = vld [vmem:[%s3861_s2 + $0x470] sm:$0xff]  ;;  %v1869_v53 = vld [vmem:[%s3861_s2 + $0x4c8] sm:$0xff] }
  0x38   : > { %2360 = vmatprep.subr.bf16.mxu1 %v2359_v36  ;;  %395 = vst.msk [vmem:[#allocation2 + $0x38] sm:$0xff] %vm392_vm1, %v390_v31  ;;  %v1852_v36 = vld [vmem:[%s3861_s2 + $0x440] sm:$0xff]  ;;  %v2381_v46 = vpack.c.bf16 %v1858_v40, %v1854_v38  ;;  %v1862_v50 = vld [vmem:[%s3861_s2 + $0x490] sm:$0xff]  ;;  %v1873_v54 = vld [vmem:[%s3861_s2 + $0x4e8] sm:$0xff] }
  0x39   : > { %586 = vmatmul.mubr.f32.vlgmr.msra.gmra.mrb[0].mxu0 %v507_v42  ;;  %v1866_v52 = vld [vmem:[%s3861_s2 + $0x4b0] sm:$0xff]  ;;  %v2339_v63 = vpack.c.bf16 %v1873_v54, %v1869_v53  ;;  %v1868_v0 = vld [vmem:[%s3861_s2 + $0x4c0] sm:$0xff]  ;;  %v1881_v7 = vld [vmem:[%s3861_s2 + $0x528] sm:$0xff] }
  0x3a   : > { %663 = vmatmul.mubr.f32.vlgmr.msra.gmra.mrb[0].mxu1 %v507_v42  ;;  %2314 = vmatpush1.bf16.msra.mxu0 %v2313_v43  ;;  %v1865_v42 = vld [vmem:[%s3861_s2 + $0x4a8] sm:$0xff]  ;;  %v1863_v43 = vld [vmem:[%s3861_s2 + $0x498] sm:$0xff]  ;;  %v1872_v1 = vld [vmem:[%s3861_s2 + $0x4e0] sm:$0xff] }
  0x3b   : > { %2362 = vmatpush1.bf16.msra.mxu1 %v2361_v44  ;;  %2316 = vmatprep.subr.bf16.mxu0 %v2315_v45  ;;  %v1867_v44 = vld [vmem:[%s3861_s2 + $0x4b8] sm:$0xff]  ;;  %v2333_v45 = vpack.c.bf16 %v1856_v37, %v1852_v36  ;;  %v2335_v47 = vpack.c.bf16 %v1865_v42, %v1861_v41  ;;  %v1870_v2 = vld [vmem:[%s3861_s2 + $0x4d0] sm:$0xff]  ;;  %v2341_v12 = vpack.c.bf16 %v1872_v1, %v1868_v0  ;;  %v1876_v15 = vld [vmem:[%s3861_s2 + $0x500] sm:$0xff] }
  0x3c   : > { %2364 = vmatprep.subr.bf16.mxu1 %v2363_v49  ;;  %v1864_v49 = vld [vmem:[%s3861_s2 + $0x4a0] sm:$0xff]  ;;  %v2383_v51 = vpack.c.bf16 %v1867_v44, %v1863_v43  ;;  %v1879_v9 = vld [vmem:[%s3861_s2 + $0x518] sm:$0xff]  ;;  %v1889_v21 = vld [vmem:[%s3861_s2 + $0x568] sm:$0xff] }
  0x3d   : > { %v2337_v58 = vpack.c.bf16 %v1864_v49, %v1860_v48  ;;  %v400_v61 = vld [vmem:[#allocation2 + $0x30] sm:$0x7f]  ;;  %v1880_v16 = vld [vmem:[%s3861_s2 + $0x520] sm:$0xff]  ;;  %v1887_v22 = vld [vmem:[%s3861_s2 + $0x558] sm:$0xff] }
  0x3e   : > { %2318 = vmatpush1.bf16.msra.mxu0 %v2317_v55  ;;  %v1871_v55 = vld [vmem:[%s3861_s2 + $0x4d8] sm:$0xff]  ;;  %v511_v3 = vrot.slane %v400_v61, 7  ;;  %v1884_v27 = vld [vmem:[%s3861_s2 + $0x540] sm:$0xff]  ;;  %v1886_v29 = vld [vmem:[%s3861_s2 + $0x550] sm:$0xff] }
  0x3f   : > { %2366 = vmatpush1.bf16.msra.mxu1 %v2365_v56  ;;  %2320 = vmatprep.subr.bf16.mxu0 %v2319_v57  ;;  %v1875_v56 = vld [vmem:[%s3861_s2 + $0x4f8] sm:$0xff]  ;;  %v1888_v28 = vld [vmem:[%s3861_s2 + $0x560] sm:$0xff]  ;;  %v1890_v31 = vld [vmem:[%s3861_s2 + $0x570] sm:$0xff] }
  0x40   : > { %2368 = vmatprep.subr.bf16.mxu1 %v2367_v62  ;;  %v401_v57 = vld [vmem:[#allocation2 + $0x38] sm:$0x7f]  ;;  %v2385_v62 = vpack.c.bf16 %v1866_v52, %v1862_v50  ;;  %v512_v11 = vsel %vm504_vm2, %v506_v30, %v511_v3  ;;  %v2349_v37 = vpack.c.bf16 %v1888_v28, %v1884_v27  ;;  %v2397_v38 = vpack.c.bf16 %v1890_v31, %v1886_v29  ;;  %v1892_v40 = vld [vmem:[%s3861_s2 + $0x580] sm:$0xff]  ;;  %v1894_v42 = vld [vmem:[%s3861_s2 + $0x590] sm:$0xff] }
  0x41   : > { %v513_v60 = vrot.slane %v401_v57, 7  ;;  %v1891_v23 = vld [vmem:[%s3861_s2 + $0x578] sm:$0xff]  ;;  %v1896_v41 = vld [vmem:[%s3861_s2 + $0x5a0] sm:$0xff]  ;;  %v1898_v44 = vld [vmem:[%s3861_s2 + $0x5b0] sm:$0xff] }
  0x42   : > { %2322 = vmatpush1.bf16.msra.mxu0 %v2321_v4  ;;  %v2387_v4 = vpack.c.bf16 %v1875_v56, %v1871_v55  ;;  %v1899_v36 = vld [vmem:[%s3861_s2 + $0x5b8] sm:$0xff]  ;;  %v2353_v49 = vpack.c.bf16 %v1896_v41, %v1892_v40  ;;  %v2401_v50 = vpack.c.bf16 %v1898_v44, %v1894_v42  ;;  %v1900_v52 = vld [vmem:[%s3861_s2 + $0x5c0] sm:$0xff]  ;;  %v1902_v54 = vld [vmem:[%s3861_s2 + $0x5d0] sm:$0xff] }
  0x43   : > { %2370 = vmatpush1.bf16.msra.mxu1 %v2369_v5  ;;  %2324 = vmatprep.subr.bf16.mxu0 %v2323_v6  ;;  %v1874_v5 = vld [vmem:[%s3861_s2 + $0x4f0] sm:$0xff]  ;;  %v1877_v6 = vld [vmem:[%s3861_s2 + $0x508] sm:$0xff]  ;;  %v514_v8 = vsel %vm504_vm2, %v509_v19, %v513_v60  ;;  %v1907_v48 = vld [vmem:[%s3861_s2 + $0x5f8] sm:$0xff] }
  0x44   : > { %2372 = vmatprep.subr.bf16.mxu1 %v2371_v10  ;;  %v1883_v10 = vld [vmem:[%s3861_s2 + $0x538] sm:$0xff]  ;;  %1809 = vmatprep.mubr.msk.f32.mxu0 %vm392_vm1, %v514_v8  ;;  %v2389_v19 = vpack.c.bf16 %v1874_v5, %v1870_v2  ;;  %v2343_v13 = vpack.c.bf16 %v1881_v7, %v1877_v6  ;;  %v1904_v53 = vld [vmem:[%s3861_s2 + $0x5e0] sm:$0xff]  ;;  %v1906_v56 = vld [vmem:[%s3861_s2 + $0x5f0] sm:$0xff] }
  0x45   : > { %1811 = vmatprep.mubr.msk.f32.mxu1 %vm392_vm1, %v514_v8  ;;  %v2391_v30 = vpack.c.bf16 %v1883_v10, %v1879_v9  ;;  %592 = vmatmul.mubr.f32.gmra.mrb[2].mxu0 %v512_v11  ;;  %v1913_v57 = vld [vmem:[%s3861_s2 + $0x608] sm:$0xff]  ;;  %v1915_v60 = vld [vmem:[%s3861_s2 + $0x618] sm:$0xff]  ;;  %v1912_v1 = vld [vmem:[%s3861_s2 + $0x600] sm:$0xff] }
  0x46   : > { %2326 = vmatpush1.bf16.msra.mxu0 %v2325_v17  ;;  %669 = vmatmul.mubr.f32.gmra.mrb[2].mxu1 %v512_v11  ;;  %v1878_v17 = vld [vmem:[%s3861_s2 + $0x510] sm:$0xff]  ;;  %v1919_v61 = vld [vmem:[%s3861_s2 + $0x638] sm:$0xff]  ;;  %v1916_v2 = vld [vmem:[%s3861_s2 + $0x620] sm:$0xff] }
  0x47   : > { %2374 = vmatpush1.bf16.msra.mxu1 %v2373_v18  ;;  %2328 = vmatprep.subr.bf16.mxu0 %v2327_v20  ;;  %v1882_v18 = vld [vmem:[%s3861_s2 + $0x530] sm:$0xff]  ;;  %v1885_v20 = vld [vmem:[%s3861_s2 + $0x548] sm:$0xff]  ;;  %v1923_v8 = vld [vmem:[%s3861_s2 + $0x658] sm:$0xff]  ;;  %v2409_v10 = vpack.c.bf16 %v1916_v2, %v1912_v1 }
  0x48   : > { %2376 = vmatprep.subr.bf16.mxu1 %v2375_v24  ;;  %1908 = vmatprep.mubr.msk.f32.mxu0 %vm392_vm1, %v3017_v14  ;;  %v2345_v24 = vpack.c.bf16 %v1880_v16, %v1876_v15  ;;  %v2393_v25 = vpack.c.bf16 %v1882_v18, %v1878_v17  ;;  %v2347_v26 = vpack.c.bf16 %v1889_v21, %v1885_v20  ;;  %v1914_v3 = vld [vmem:[%s3861_s2 + $0x610] sm:$0xff]  ;;  %v1921_v6 = vld [vmem:[%s3861_s2 + $0x648] sm:$0xff]  ;;  %v1927_v9 = vld [vmem:[%s3861_s2 + $0x678] sm:$0xff] }
  0x49   : > { %1910 = vmatprep.mubr.msk.f32.mxu1 %vm392_vm1, %v3017_v14  ;;  %v2395_v14 = vpack.c.bf16 %v1891_v23, %v1887_v22  ;;  %v1918_v5 = vld [vmem:[%s3861_s2 + $0x630] sm:$0xff]  ;;  %v1925_v7 = vld [vmem:[%s3861_s2 + $0x668] sm:$0xff]  ;;  %v3380_v11 = vld [vmem:[#allocation2 + $0x38] sm:$0xff]  ;;  %v2459_v17 = vpack.c.bf16 %v1927_v9, %v1923_v8 }
  0x4a   : > { %2330 = vmatpush1.bf16.msra.mxu0 %v2329_v32  ;;  %v1893_v32 = vld [vmem:[%s3861_s2 + $0x588] sm:$0xff]  ;;  %v1924_v15 = vld [vmem:[%s3861_s2 + $0x660] sm:$0xff]  ;;  %v1922_v16 = vld [vmem:[%s3861_s2 + $0x650] sm:$0xff] }
  0x4b   : > { %2378 = vmatpush1.bf16.msra.mxu1 %v2377_v34  ;;  %2332 = vmatprep.subr.bf16.mxu0 %v2331_v35  ;;  %v1897_v34 = vld [vmem:[%s3861_s2 + $0x5a8] sm:$0xff]  ;;  %v1895_v35 = vld [vmem:[%s3861_s2 + $0x598] sm:$0xff]  ;;  %v1928_v29 = vld [vmem:[%s3861_s2 + $0x680] sm:$0xff] }
  0x4c   : > { %2380 = vmatprep.subr.bf16.mxu1 %v2379_v39  ;;  %v2351_v39 = vpack.c.bf16 %v1897_v34, %v1893_v32  ;;  %v2399_v43 = vpack.c.bf16 %v1899_v36, %v1895_v35  ;;  %v1929_v18 = vld [vmem:[%s3861_s2 + $0x688] sm:$0xff]  ;;  %v1931_v21 = vld [vmem:[%s3861_s2 + $0x698] sm:$0xff]  ;;  %v1934_v32 = vld [vmem:[%s3861_s2 + $0x6b0] sm:$0xff] }
  0x4d   : > { %v1933_v20 = vld [vmem:[%s3861_s2 + $0x6a8] sm:$0xff]  ;;  %v1935_v22 = vld [vmem:[%s3861_s2 + $0x6b8] sm:$0xff]  ;;  %v1936_v42 = vld [vmem:[%s3861_s2 + $0x6c0] sm:$0xff] }
  0x4e   : > { %2334 = vmatpush1.bf16.msra.mxu0 %v2333_v45  ;;  %v1901_v45 = vld [vmem:[%s3861_s2 + $0x5c8] sm:$0xff]  ;;  %v2415_v28 = vpack.c.bf16 %v1933_v20, %v1929_v18  ;;  %v2463_v31 = vpack.c.bf16 %v1935_v22, %v1931_v21  ;;  %v1939_v36 = vld [vmem:[%s3861_s2 + $0x6d8] sm:$0xff]  ;;  %v1938_v44 = vld [vmem:[%s3861_s2 + $0x6d0] sm:$0xff] }
  0x4f   : > { %2382 = vmatpush1.bf16.msra.mxu1 %v2381_v46  ;;  %2336 = vmatprep.subr.bf16.mxu0 %v2335_v47  ;;  %v1905_v46 = vld [vmem:[%s3861_s2 + $0x5e8] sm:$0xff]  ;;  %v1903_v47 = vld [vmem:[%s3861_s2 + $0x5d8] sm:$0xff]  ;;  %v1966_v20 = vld [vmem:[%s3861_s2 + $0x7b0] sm:$0xff] }
  0x50   : > { %2384 = vmatprep.subr.bf16.mxu1 %v2383_v51  ;;  %v2355_v51 = vpack.c.bf16 %v1905_v46, %v1901_v45  ;;  %v2403_v55 = vpack.c.bf16 %v1907_v48, %v1903_v47  ;;  %v969_v23 = vld [vmem:[#allocation2 + $0x28] sm:$0xfe]  ;;  %v1942_v46 = vld [vmem:[%s3861_s2 + $0x6f0] sm:$0xff] }
  0x51   : > { %v1937_v34 = vld [vmem:[%s3861_s2 + $0x6c8] sm:$0xff] }
  0x52   : > { %2338 = vmatpush1.bf16.msra.mxu0 %v2337_v58  ;;  %v1917_v58 = vld [vmem:[%s3861_s2 + $0x628] sm:$0xff] }
  0x53   : > { %2386 = vmatpush1.bf16.msra.mxu1 %v2385_v62  ;;  %2340 = vmatprep.subr.bf16.mxu0 %v2339_v63  ;;  %v2357_v62 = vpack.c.bf16 %v1904_v53, %v1900_v52  ;;  %v2405_v63 = vpack.c.bf16 %v1906_v56, %v1902_v54  ;;  %v2407_v0 = vpack.c.bf16 %v1917_v58, %v1913_v57  ;;  %v1941_v35 = vld [vmem:[%s3861_s2 + $0x6e8] sm:$0xff]  ;;  %v1944_v54 = vld [vmem:[%s3861_s2 + $0x700] sm:$0xff]  ;;  %v1946_v56 = vld [vmem:[%s3861_s2 + $0x710] sm:$0xff] }
  0x54   : > { %2388 = vmatprep.subr.bf16.mxu1 %v2387_v4  ;;  %v2455_v4 = vpack.c.bf16 %v1919_v61, %v1915_v60  ;;  %v2419_v41 = vpack.c.bf16 %v1941_v35, %v1937_v34  ;;  %v1945_v47 = vld [vmem:[%s3861_s2 + $0x708] sm:$0xff]  ;;  %v2469_v52 = vpack.c.bf16 %v1942_v46, %v1938_v44  ;;  %v1950_v58 = vld [vmem:[%s3861_s2 + $0x730] sm:$0xff] }
  0x55   : > { %v1949_v48 = vld [vmem:[%s3861_s2 + $0x728] sm:$0xff]  ;;  %v2473_v1 = vpack.c.bf16 %v1950_v58, %v1946_v56 }
  0x56   : > { %2342 = vmatpush1.bf16.msra.mxu0 %v2341_v12  ;;  %v2457_v12 = vpack.c.bf16 %v1918_v5, %v1914_v3  ;;  %v2423_v53 = vpack.c.bf16 %v1949_v48, %v1945_v47  ;;  %v1953_v60 = vld [vmem:[%s3861_s2 + $0x748] sm:$0xff]  ;;  %v1952_v3 = vld [vmem:[%s3861_s2 + $0x740] sm:$0xff]  ;;  %v1954_v5 = vld [vmem:[%s3861_s2 + $0x750] sm:$0xff] }
  0x57   : > { %2390 = vmatpush1.bf16.msra.mxu1 %v2389_v19  ;;  %2344 = vmatprep.subr.bf16.mxu0 %v2343_v13  ;;  %v2411_v19 = vpack.c.bf16 %v1925_v7, %v1921_v6  ;;  %v1920_v13 = vld [vmem:[%s3861_s2 + $0x640] sm:$0xff]  ;;  %v1957_v61 = vld [vmem:[%s3861_s2 + $0x768] sm:$0xff]  ;;  %v1958_v7 = vld [vmem:[%s3861_s2 + $0x770] sm:$0xff] }
  0x58   : > { %2392 = vmatprep.subr.bf16.mxu1 %v2391_v30  ;;  %v1926_v30 = vld [vmem:[%s3861_s2 + $0x670] sm:$0xff]  ;;  %v2427_v2 = vpack.c.bf16 %v1957_v61, %v1953_v60  ;;  %v1961_v8 = vld [vmem:[%s3861_s2 + $0x788] sm:$0xff]  ;;  %v1987_v48 = vld [vmem:[%s3861_s2 + $0x858] sm:$0xff] }
  0x59   : > { %v2461_v27 = vpack.c.bf16 %v1926_v30, %v1922_v16  ;;  %v1965_v9 = vld [vmem:[%s3861_s2 + $0x7a8] sm:$0xff]  ;;  %v1960_v16 = vld [vmem:[%s3861_s2 + $0x780] sm:$0xff]  ;;  %v1962_v30 = vld [vmem:[%s3861_s2 + $0x790] sm:$0xff] }
  0x5a   : > { %2346 = vmatpush1.bf16.msra.mxu0 %v2345_v24  ;;  %v1082_v24 = vrot.slane %v3380_v11, 1  ;;  %v1969_v21 = vld [vmem:[%s3861_s2 + $0x7c8] sm:$0xff]  ;;  %v1995_v61 = vld [vmem:[%s3861_s2 + $0x898] sm:$0xff] }
  0x5b   : > { %2394 = vmatpush1.bf16.msra.mxu1 %v2393_v25  ;;  %2348 = vmatprep.subr.bf16.mxu0 %v2347_v26  ;;  %v2413_v25 = vpack.c.bf16 %v1924_v15, %v1920_v13  ;;  %v1081_v26 = vrot.slane %v969_v23, 1  ;;  %v2477_v13 = vpack.c.bf16 %v1958_v7, %v1954_v5  ;;  %v2431_v15 = vpack.c.bf16 %v1965_v9, %v1961_v8  ;;  %v1973_v22 = vld [vmem:[%s3861_s2 + $0x7e8] sm:$0xff]  ;;  %v1971_v23 = vld [vmem:[%s3861_s2 + $0x7d8] sm:$0xff] }
  0x5c   : > { %2396 = vmatprep.subr.bf16.mxu1 %v2395_v14  ;;  %v1932_v14 = vld [vmem:[%s3861_s2 + $0x6a0] sm:$0xff]  ;;  %v1977_v34 = vld [vmem:[%s3861_s2 + $0x808] sm:$0xff]  ;;  %v2003_v9 = vld [vmem:[%s3861_s2 + $0x8d8] sm:$0xff] }
  0x5d   : > { %v1981_v35 = vld [vmem:[%s3861_s2 + $0x828] sm:$0xff] }
  0x5e   : > { %2350 = vmatpush1.bf16.msra.mxu0 %v2349_v37  ;;  %v1943_v37 = vld [vmem:[%s3861_s2 + $0x6f8] sm:$0xff]  ;;  %v1985_v46 = vld [vmem:[%s3861_s2 + $0x848] sm:$0xff] }
  0x5f   : > { %2398 = vmatpush1.bf16.msra.mxu1 %v2397_v38  ;;  %2352 = vmatprep.subr.bf16.mxu0 %v2351_v39  ;;  %v1083_v38 = vsel %vm1077_vm3, %v1081_v26, %v1082_v24  ;;  %v2417_v39 = vpack.c.bf16 %v1932_v14, %v1928_v29  ;;  %v2467_v45 = vpack.c.bf16 %v1943_v37, %v1939_v36  ;;  %v1968_v29 = vld [vmem:[%s3861_s2 + $0x7c0] sm:$0xff]  ;;  %v1979_v36 = vld [vmem:[%s3861_s2 + $0x818] sm:$0xff]  ;;  %v1989_v47 = vld [vmem:[%s3861_s2 + $0x868] sm:$0xff] }
  0x60   : > { %2400 = vmatprep.subr.bf16.mxu1 %v2399_v43  ;;  %v1940_v43 = vld [vmem:[%s3861_s2 + $0x6e0] sm:$0xff]  ;;  %v1983_v37 = vld [vmem:[%s3861_s2 + $0x838] sm:$0xff]  ;;  %v1993_v58 = vld [vmem:[%s3861_s2 + $0x888] sm:$0xff] }
  0x61   : > { %v1972_v14 = vld [vmem:[%s3861_s2 + $0x7e0] sm:$0xff]  ;;  %v2487_v44 = vpack.c.bf16 %v1983_v37, %v1979_v36  ;;  %v1997_v60 = vld [vmem:[%s3861_s2 + $0x8a8] sm:$0xff] }
  0x62   : > { %2354 = vmatpush1.bf16.msra.mxu0 %v2353_v49  ;;  %v1947_v49 = vld [vmem:[%s3861_s2 + $0x718] sm:$0xff]  ;;  %v2001_v7 = vld [vmem:[%s3861_s2 + $0x8c8] sm:$0xff]  ;;  %v1332_v36 = vld [vmem:[%s3863_s4] sm:$0xff] }
  0x63   : > { %2402 = vmatpush1.bf16.msra.mxu1 %v2401_v50  ;;  %2356 = vmatprep.subr.bf16.mxu0 %v2355_v51  ;;  %v1951_v50 = vld [vmem:[%s3861_s2 + $0x738] sm:$0xff]  ;;  %v2421_v51 = vpack.c.bf16 %v1940_v43, %v1936_v42  ;;  %v1980_v42 = vld [vmem:[%s3861_s2 + $0x820] sm:$0xff]  ;;  %v1978_v43 = vld [vmem:[%s3861_s2 + $0x810] sm:$0xff] }
  0x64   : > { %2404 = vmatprep.subr.bf16.mxu1 %v2403_v55  ;;  %v1948_v55 = vld [vmem:[%s3861_s2 + $0x720] sm:$0xff]  ;;  %v2471_v57 = vpack.c.bf16 %v1951_v50, %v1947_v49  ;;  %v1991_v49 = vld [vmem:[%s3861_s2 + $0x878] sm:$0xff]  ;;  %v2005_v8 = vld [vmem:[%s3861_s2 + $0x8e8] sm:$0xff] }
  0x65   : > { %v2491_v56 = vpack.c.bf16 %v1991_v49, %v1987_v48  ;;  %v1333_v37 = vld [vmem:[%s3863_s4 + $0x8] sm:$0xff]  ;;  %v1336_v48 = vld [vmem:[%s3863_s4 + $0x20] sm:$0xff] }
  0x66   : > { %2358 = vmatpush1.bf16.msra.mxu0 %v2357_v62  ;;  %v1955_v62 = vld [vmem:[%s3861_s2 + $0x758] sm:$0xff]  ;;  %v1337_v49 = vld [vmem:[%s3863_s4 + $0x28] sm:$0xff] }
  0x67   : > { %2406 = vmatpush1.bf16.msra.mxu1 %v2405_v63  ;;  %2408 = vmatprep.subr.bf16.mxu0 %v2407_v0  ;;  %v1959_v63 = vld [vmem:[%s3861_s2 + $0x778] sm:$0xff]  ;;  %v2425_v0 = vpack.c.bf16 %v1948_v55, %v1944_v54  ;;  %v1988_v54 = vld [vmem:[%s3861_s2 + $0x860] sm:$0xff]  ;;  %v1986_v55 = vld [vmem:[%s3861_s2 + $0x850] sm:$0xff] }
  0x68   : > { %2456 = vmatprep.subr.bf16.mxu1 %v2455_v4  ;;  %v1956_v4 = vld [vmem:[%s3861_s2 + $0x760] sm:$0xff]  ;;  %v2475_v6 = vpack.c.bf16 %v1959_v63, %v1955_v62  ;;  %v1999_v62 = vld [vmem:[%s3861_s2 + $0x8b8] sm:$0xff] }
  0x69   : > { %855 = vmatmul.mubr.f32.vlgmr.msra.gmra.mrb[0].mxu0 %v2981_v59  ;;  %v2495_v5 = vpack.c.bf16 %v1999_v62, %v1995_v61  ;;  %v1340_v61 = vld [vmem:[%s3863_s4 + $0x40] sm:$0xff]  ;;  %v1341_v62 = vld [vmem:[%s3863_s4 + $0x48] sm:$0xff] }
  0x6a   : > { %932 = vmatmul.mubr.f32.vlgmr.msra.gmra.mrb[0].mxu1 %v2981_v59  ;;  %2410 = vmatpush1.bf16.msra.mxu0 %v2409_v10  ;;  %v1930_v59 = vld [vmem:[%s3861_s2 + $0x690] sm:$0xff]  ;;  %v1963_v10 = vld [vmem:[%s3861_s2 + $0x798] sm:$0xff] }
  0x6b   : > { %2458 = vmatpush1.bf16.msra.mxu1 %v2457_v12  ;;  %2412 = vmatprep.subr.bf16.mxu0 %v2411_v19  ;;  %v2465_v40 = vpack.c.bf16 %v1934_v32, %v1930_v59  ;;  %v1967_v12 = vld [vmem:[%s3861_s2 + $0x7b8] sm:$0xff]  ;;  %v2429_v19 = vpack.c.bf16 %v1956_v4, %v1952_v3  ;;  %v1970_v59 = vld [vmem:[%s3861_s2 + $0x7d0] sm:$0xff]  ;;  %v1996_v3 = vld [vmem:[%s3861_s2 + $0x8a0] sm:$0xff] }
  0x6c   : > { %2460 = vmatprep.subr.bf16.mxu1 %v2459_v17  ;;  %1909 = vmatprep.mubr.msk.f32.mxu0 %vm392_vm1, %v3380_v11  ;;  %v1964_v17 = vld [vmem:[%s3861_s2 + $0x7a0] sm:$0xff]  ;;  %v2479_v18 = vpack.c.bf16 %v1967_v12, %v1963_v10  ;;  %v1974_v32 = vld [vmem:[%s3861_s2 + $0x7f0] sm:$0xff]  ;;  %v2007_v10 = vld [vmem:[%s3861_s2 + $0x8f8] sm:$0xff] }
  0x6d   : > { %1911 = vmatprep.mubr.msk.f32.mxu1 %vm392_vm1, %v3380_v11  ;;  %861 = vmatmul.mubr.f32.gmra.mrb[2].mxu0 %v3173_v33  ;;  %v2433_v26 = vpack.c.bf16 %v1964_v17, %v1960_v16  ;;  %v1994_v4 = vld [vmem:[%s3861_s2 + $0x890] sm:$0xff]  ;;  %v2004_v16 = vld [vmem:[%s3861_s2 + $0x8e0] sm:$0xff]  ;;  %v2017_v11 = vld [vmem:[%s3863_s4 + $0x88] sm:$0xff] }
  0x6e   : > { %2414 = vmatpush1.bf16.msra.mxu0 %v2413_v25  ;;  %938 = vmatmul.mubr.f32.gmra.mrb[2].mxu1 %v3173_v33  ;;  %v1975_v25 = vld [vmem:[%s3861_s2 + $0x7f8] sm:$0xff]  ;;  %v968_v17 = vld [vmem:[#allocation2 + $0x20] sm:$0xfe] }
  0x6f   : > { %2462 = vmatpush1.bf16.msra.mxu1 %v2461_v27  ;;  %2416 = vmatprep.subr.bf16.mxu0 %v2415_v28  ;;  %v2481_v27 = vpack.c.bf16 %v1966_v20, %v1962_v30  ;;  %v2435_v28 = vpack.c.bf16 %v1973_v22, %v1969_v21  ;;  %v2499_v30 = vpack.c.bf16 %v2007_v10, %v2003_v9  ;;  %v2006_v20 = vld [vmem:[%s3861_s2 + $0x8f0] sm:$0xff]  ;;  %v973_v21 = vld [vmem:[#allocation2 + $0x48] sm:$0x1]  ;;  %v1344_v9 = vld [vmem:[%s3863_s4 + $0x60] sm:$0xff] }
  0x70   : > { %2464 = vmatprep.subr.bf16.mxu1 %v2463_v31  ;;  %2008 = vmatprep.mubr.msk.f32.mxu0 %vm392_vm1, %v1083_v38  ;;  %v2483_v31 = vpack.c.bf16 %v1975_v25, %v1971_v23  ;;  %v1078_v23 = vrot.slane %v968_v17, 1  ;;  %v1079_v25 = vrot.slane %v3173_v33, 1  ;;  %v1345_v10 = vld [vmem:[%s3863_s4 + $0x68] sm:$0xff] }
  0x71   : > { %2010 = vmatprep.mubr.msk.f32.mxu1 %vm392_vm1, %v1083_v38  ;;  %v2437_v38 = vpack.c.bf16 %v1972_v14, %v1968_v29  ;;  %v2033_v17 = vld [vmem:[%s3863_s4 + $0x108] sm:$0xff] }
  0x72   : > { %2418 = vmatpush1.bf16.msra.mxu0 %v2417_v39  ;;  %v2485_v39 = vpack.c.bf16 %v1974_v32, %v1970_v59  ;;  %v1080_v29 = vsel %vm1077_vm3, %v1078_v23, %v1079_v25 }
  0x73   : > { %2466 = vmatpush1.bf16.msra.mxu1 %v2465_v40  ;;  %2420 = vmatprep.subr.bf16.mxu0 %v2419_v41  ;;  %v2439_v40 = vpack.c.bf16 %v1981_v35, %v1977_v34  ;;  %v1976_v41 = vld [vmem:[%s3861_s2 + $0x800] sm:$0xff]  ;;  %v2019_v34 = vld [vmem:[%s3863_s4 + $0x98] sm:$0xff] }
  0x74   : > { %2468 = vmatprep.subr.bf16.mxu1 %v2467_v45  ;;  %v1982_v45 = vld [vmem:[%s3861_s2 + $0x830] sm:$0xff]  ;;  %v2441_v50 = vpack.c.bf16 %v1980_v42, %v1976_v41 }
  0x75   : > { %v1334_v42 = vld [vmem:[%s3863_s4 + $0x10] sm:$0xff] }
  0x76   : > { %2422 = vmatpush1.bf16.msra.mxu0 %v2421_v51  ;;  %v2489_v51 = vpack.c.bf16 %v1982_v45, %v1978_v43  ;;  %v1335_v43 = vld [vmem:[%s3863_s4 + $0x18] sm:$0xff]  ;;  %v2022_v45 = vld [vmem:[%s3863_s4 + $0xb0] sm:$0xff] }
  0x77   : > { %2470 = vmatpush1.bf16.msra.mxu1 %v2469_v52  ;;  %2424 = vmatprep.subr.bf16.mxu0 %v2423_v53  ;;  %v2443_v52 = vpack.c.bf16 %v1989_v47, %v1985_v46  ;;  %v1984_v53 = vld [vmem:[%s3861_s2 + $0x840] sm:$0xff]  ;;  %v2023_v46 = vld [vmem:[%s3863_s4 + $0xb8] sm:$0xff] }
  0x78   : > { %2472 = vmatprep.subr.bf16.mxu1 %v2471_v57  ;;  %v1990_v57 = vld [vmem:[%s3861_s2 + $0x870] sm:$0xff]  ;;  %v2445_v63 = vpack.c.bf16 %v1988_v54, %v1984_v53  ;;  %v2547_v47 = vpack.c.bf16 %v2023_v46, %v2022_v45 }
  0x79   : > { %v1338_v54 = vld [vmem:[%s3863_s4 + $0x30] sm:$0xff] }
  0x7a   : > { %2426 = vmatpush1.bf16.msra.mxu0 %v2425_v0  ;;  %v2493_v0 = vpack.c.bf16 %v1990_v57, %v1986_v55  ;;  %v1339_v55 = vld [vmem:[%s3863_s4 + $0x38] sm:$0xff]  ;;  %v2026_v57 = vld [vmem:[%s3863_s4 + $0xd0] sm:$0xff] }
  0x7b   : > { %2474 = vmatpush1.bf16.msra.mxu1 %v2473_v1  ;;  %2428 = vmatprep.subr.bf16.mxu0 %v2427_v2  ;;  %v2447_v1 = vpack.c.bf16 %v1997_v60, %v1993_v58  ;;  %v1992_v2 = vld [vmem:[%s3861_s2 + $0x880] sm:$0xff]  ;;  %v2027_v58 = vld [vmem:[%s3863_s4 + $0xd8] sm:$0xff] }
  0x7c   : > { %2476 = vmatprep.subr.bf16.mxu1 %v2475_v6  ;;  %v1998_v6 = vld [vmem:[%s3861_s2 + $0x8b0] sm:$0xff]  ;;  %v2449_v12 = vpack.c.bf16 %v1996_v3, %v1992_v2  ;;  %v2555_v60 = vpack.c.bf16 %v2027_v58, %v2026_v57  ;;  %v2048_v58 = vld [vmem:[%s3862_s3] ss:$0 sm:$0xff] }
  0x7d   : > { %v1342_v3 = vld [vmem:[%s3863_s4 + $0x50] sm:$0xff] }
  0x7e   : > { %2430 = vmatpush1.bf16.msra.mxu0 %v2429_v19  ;;  %v2497_v19 = vpack.c.bf16 %v1998_v6, %v1994_v4  ;;  %v1343_v4 = vld [vmem:[%s3863_s4 + $0x58] sm:$0xff]  ;;  %v2030_v6 = vld [vmem:[%s3863_s4 + $0xf0] sm:$0xff] }
  0x7f   : > { %2478 = vmatpush1.bf16.msra.mxu1 %v2477_v13  ;;  %2432 = vmatprep.subr.bf16.mxu0 %v2431_v15  ;;  %v2451_v13 = vpack.c.bf16 %v2005_v8, %v2001_v7  ;;  %v2000_v15 = vld [vmem:[%s3861_s2 + $0x8c0] sm:$0xff]  ;;  %v2031_v7 = vld [vmem:[%s3863_s4 + $0xf8] sm:$0xff] }
  0x80   : > { %2480 = vmatprep.subr.bf16.mxu1 %v2479_v18  ;;  %v2002_v18 = vld [vmem:[%s3861_s2 + $0x8d0] sm:$0xff]  ;;  %v2453_v22 = vpack.c.bf16 %v2004_v16, %v2000_v15  ;;  %v2563_v8 = vpack.c.bf16 %v2031_v7, %v2030_v6  ;;  %v2032_v16 = vld [vmem:[%s3863_s4 + $0x100] sm:$0xff]  ;;  %v2037_v7 = vld [vmem:[%s3863_s4 + $0x128] sm:$0xff] }
  0x82   : > { %2434 = vmatpush1.bf16.msra.mxu0 %v2433_v26  ;;  %v2501_v26 = vpack.c.bf16 %v2006_v20, %v2002_v18  ;;  %v1272_v18 = vld [vmem:[%s361_s26] sm:$0xff] }
  0x83   : > { %2482 = vmatpush1.bf16.msra.mxu1 %v2481_v27  ;;  %2436 = vmatprep.subr.bf16.mxu0 %v2435_v28  ;;  %v1086_v27 = vrot.slane %v973_v21, 1  ;;  %v972_v28 = vld [vmem:[#allocation2 + $0x40] sm:$0x1]  ;;  %v2012_v21 = vld [vmem:[%s3862_s3 + $0x1] ss:$0 sm:$0xff] }
  0x84   : > { %2484 = vmatprep.subr.bf16.mxu1 %v2483_v31  ;;  %v1084_v14 = vrot.slane %v972_v28, 1  ;;  %v2016_v31 = vld [vmem:[%s3863_s4 + $0x80] sm:$0xff]  ;;  %v1297_v28 = vld [vmem:[%s3866_s7 + $0x8] sm:$0xff] }
  0x85   : > { %v1087_v59 = vsel %vm1077_vm3, %v1082_v24, %v1086_v27  ;;  %v2535_v32 = vpack.c.bf16 %v2017_v11, %v2016_v31  ;;  %v2018_v24 = vld [vmem:[%s3863_s4 + $0x90] sm:$0xff]  ;;  %v1296_v20 = vld [vmem:[%s3866_s7] sm:$0xff]  ;;  %v1273_v27 = vld [vmem:[%s361_s26 + $0x8] sm:$0xff] }
  0x86   : > { %2438 = vmatpush1.bf16.msra.mxu0 %v2437_v38  ;;  %v1085_v33 = vsel %vm1077_vm3, %v1079_v25, %v1084_v14  ;;  %v2539_v35 = vpack.c.bf16 %v2019_v34, %v2018_v24  ;;  %v2503_v38 = vpack.c.bf16 %v1333_v37, %v1332_v36  ;;  %v1298_v23 = vmul.f32 %v1296_v20, %v1272_v18  ;;  %v2042_v20 = vld [vmem:[%s3863_s4 + $0x150] sm:$0xff] }
  0x87   : > { %2486 = vmatpush1.bf16.msra.mxu1 %v2485_v39  ;;  %2440 = vmatprep.subr.bf16.mxu0 %v2439_v40  ;;  %v2020_v39 = vld [vmem:[%s3863_s4 + $0xa0] sm:$0xff]  ;;  %v2021_v40 = vld [vmem:[%s3863_s4 + $0xa8] sm:$0xff]  ;;  %v1299_v31 = vmul.f32 %v1297_v28, %v1273_v27  ;;  %v2046_v28 = vld [vmem:[%s3863_s4 + $0x170] sm:$0xff] }
  0x88   : > { %2488 = vmatprep.subr.bf16.mxu1 %v2487_v44  ;;  %v2543_v41 = vpack.c.bf16 %v2021_v40, %v2020_v39  ;;  %v2507_v44 = vpack.c.bf16 %v1335_v43, %v1334_v42 }
  0x8a   : > { %2442 = vmatpush1.bf16.msra.mxu0 %v2441_v50  ;;  %v2511_v50 = vpack.c.bf16 %v1337_v49, %v1336_v48 }
  0x8b   : > { %2490 = vmatpush1.bf16.msra.mxu1 %v2489_v51  ;;  %2444 = vmatprep.subr.bf16.mxu0 %v2443_v52  ;;  %v2024_v51 = vld [vmem:[%s3863_s4 + $0xc0] sm:$0xff]  ;;  %v2025_v52 = vld [vmem:[%s3863_s4 + $0xc8] sm:$0xff] }
  0x8c   : > { %2492 = vmatprep.subr.bf16.mxu1 %v2491_v56  ;;  %v2551_v53 = vpack.c.bf16 %v2025_v52, %v2024_v51  ;;  %v2515_v56 = vpack.c.bf16 %v1339_v55, %v1338_v54 }
  0x8e   : > { %2446 = vmatpush1.bf16.msra.mxu0 %v2445_v63  ;;  %v2519_v63 = vpack.c.bf16 %v1341_v62, %v1340_v61 }
  0x8f   : > { %2494 = vmatpush1.bf16.msra.mxu1 %v2493_v0  ;;  %2448 = vmatprep.subr.bf16.mxu0 %v2447_v1  ;;  %v2028_v0 = vld [vmem:[%s3863_s4 + $0xe0] sm:$0xff]  ;;  %v2029_v1 = vld [vmem:[%s3863_s4 + $0xe8] sm:$0xff] }
  0x90   : > { %2496 = vmatprep.subr.bf16.mxu1 %v2495_v5  ;;  %v2559_v2 = vpack.c.bf16 %v2029_v1, %v2028_v0  ;;  %v2523_v5 = vpack.c.bf16 %v1343_v4, %v1342_v3  ;;  %v2034_v0 = vld [vmem:[%s3863_s4 + $0x110] sm:$0xff]  ;;  %v2035_v1 = vld [vmem:[%s3863_s4 + $0x118] sm:$0xff]  ;;  %v2036_v3 = vld [vmem:[%s3863_s4 + $0x120] sm:$0xff] }
  0x91   : > { %v1662_v4 = vld [vmem:[%s3865_s6] sm:$0xff] }
  0x92   : > { %2450 = vmatpush1.bf16.msra.mxu0 %v2449_v12  ;;  %v2527_v12 = vpack.c.bf16 %v1345_v10, %v1344_v9 }
  0x93   : > { %2498 = vmatpush1.bf16.msra.mxu1 %v2497_v19  ;;  %2452 = vmatprep.subr.bf16.mxu0 %v2451_v13  ;;  %v1346_v19 = vld [vmem:[%s3863_s4 + $0x70] sm:$0xff]  ;;  %v1347_v13 = vld [vmem:[%s3863_s4 + $0x78] sm:$0xff] }
  0x94   : > { %2500 = vmatprep.subr.bf16.mxu1 %v2499_v30  ;;  %v2531_v15 = vpack.c.bf16 %v1347_v13, %v1346_v19  ;;  %v3758_v30 = vpack.c.bf16 %v2033_v17, %v2032_v16  ;;  %v2038_v19 = vld [vmem:[%s3863_s4 + $0x130] sm:$0xff]  ;;  %v2039_v13 = vld [vmem:[%s3863_s4 + $0x138] sm:$0xff]  ;;  %v2040_v17 = vld [vmem:[%s3863_s4 + $0x140] sm:$0xff] }
  0x95   : > { %v2579_v16 = vpack.c.bf16 %v2039_v13, %v2038_v19 }
  0x96   : > { %2454 = vmatpush1.bf16.msra.mxu0 %v2453_v22 }
  0x97   : > { %2502 = vmatpush1.bf16.msra.mxu1 %v2501_v26  ;;  %2504 = vmatprep.subr.bf16.mxu0 %v2503_v38 }
  0x98   : > { %2536 = vmatprep.subr.bf16.mxu1 %v2535_v32 }
  0x99   : > { %1159 = vmatmul.mubr.f32.vlgmr.msra.gmra.mrb[0].mxu0 %v1080_v29 }
  0x9a   : > { %1236 = vmatmul.mubr.f32.vlgmr.msra.gmra.mrb[0].mxu1 %v1080_v29  ;;  %2009 = vmatprep.mubr.msk.f32.mxu0 %vm392_vm1, %v1087_v59 }
  0x9b   : > { %2011 = vmatprep.mubr.msk.f32.mxu1 %vm392_vm1, %v1087_v59  ;;  %2538 = vmatpush3.bf16.msra.mxu1 %v2535_v32 }
  0x9c   : > { %2540 = vmatprep.subr.bf16.mxu1 %v2539_v35  ;;  %2506 = vmatpush3.bf16.msra.mxu0 %v2503_v38  ;;  %v2013_v38 = vld [vmem:[%s3862_s3 + $0x3] ss:$0 sm:$0xff] }
  0x9d   : > { %1165 = vmatmul.mubr.f32.gmra.mrb[2].mxu0 %v1085_v33  ;;  %2508 = vmatprep.subr.bf16.mxu0 %v2507_v44 }
  0x9e   : > { %1242 = vmatmul.mubr.f32.gmra.mrb[2].mxu1 %v1085_v33 }
  0x9f   : > { %2542 = vmatpush3.bf16.msra.mxu1 %v2539_v35 }
  0xa0   : > { %2544 = vmatprep.subr.bf16.mxu1 %v2543_v41  ;;  %2510 = vmatpush3.bf16.msra.mxu0 %v2507_v44 }
  0xa1   : > { %2512 = vmatprep.subr.bf16.mxu0 %v2511_v50 }
  0xa3   : > { %2546 = vmatpush3.bf16.msra.mxu1 %v2543_v41 }
  0xa4   : > { %2548 = vmatprep.subr.bf16.mxu1 %v2547_v47  ;;  %2514 = vmatpush3.bf16.msra.mxu0 %v2511_v50 }
  0xa5   : > { %2516 = vmatprep.subr.bf16.mxu0 %v2515_v56 }
  0xa7   : > { %2550 = vmatpush3.bf16.msra.mxu1 %v2547_v47 }
  0xa8   : > { %2552 = vmatprep.subr.bf16.mxu1 %v2551_v53  ;;  %2518 = vmatpush3.bf16.msra.mxu0 %v2515_v56  ;;  %v1663_v56 = vld [vmem:[%s3865_s6 + $0x8] sm:$0xff] }
  0xa9   : > { %2520 = vmatprep.subr.bf16.mxu0 %v2519_v63 }
  0xab   : > { %2554 = vmatpush3.bf16.msra.mxu1 %v2551_v53 }
  0xac   : > { %2556 = vmatprep.subr.bf16.mxu1 %v2555_v60  ;;  %2522 = vmatpush3.bf16.msra.mxu0 %v2519_v63 }
  0xad   : > { %2524 = vmatprep.subr.bf16.mxu0 %v2523_v5 }
  0xaf   : > { %2558 = vmatpush3.bf16.msra.mxu1 %v2555_v60 }
  0xb0   : > { %2560 = vmatprep.subr.bf16.mxu1 %v2559_v2  ;;  %2526 = vmatpush3.bf16.msra.mxu0 %v2523_v5 }
  0xb1   : > { %2528 = vmatprep.subr.bf16.mxu0 %v2527_v12 }
  0xb3   : > { %2562 = vmatpush3.bf16.msra.mxu1 %v2559_v2  ;;  %v2571_v2 = vpack.c.bf16 %v2035_v1, %v2034_v0 }
  0xb4   : > { %2564 = vmatprep.subr.bf16.mxu1 %v2563_v8  ;;  %2530 = vmatpush3.bf16.msra.mxu0 %v2527_v12  ;;  %v2575_v12 = vpack.c.bf16 %v2037_v7, %v2036_v3 }
  0xb5   : > { %2532 = vmatprep.subr.bf16.mxu0 %v2531_v15 }
  0xb7   : > { %2566 = vmatpush3.bf16.msra.mxu1 %v2563_v8 }
  0xb8   : > { %2534 = vmatpush3.bf16.msra.mxu0 %v2531_v15 }
  0xb9   : > { %2568 = vmatprep.subr.bf16.mxu0 %v3758_v30 }
 0x16c   : > { %v3774_v22 = vpop.f32.mrb[0].mxu0 }
 0x16d   : > { %v3776_v25 = vpop.f32.mrb[0].mxu1  ;;  %v1162_v26 = vpop.f32.mrb[1].mxu0  ;;  %v1640_v9 = vadd.f32 %v2048_v58, %v3774_v22 }
 0x16e   : > { %v1283_v29 = vadd.f32 %v2012_v21, %v1162_v26  ;;  %v1239_v14 = vpop.f32.mrb[1].mxu1  ;;  %v2045_v26 = vld [vmem:[%s3863_s4 + $0x168] sm:$0xff] }
 0x16f   : > { %v1294_v39 = vadd.f32 %v2013_v38, %v1239_v14 }
 0x170   : > { %v1300_v59 = vadd.f32 %v1298_v23, %v1283_v29  ;;  %v1166_v33 = vpop.f32.mrb[2].mxu0  ;;  %v2044_v23 = vld [vmem:[%s3863_s4 + $0x160] sm:$0xff]  ;;  %v2047_v29 = vld [vmem:[%s3863_s4 + $0x178] sm:$0xff] }
 0x171   : > { %v3781_v11 = vpop.f32.mrb[2].mxu1  ;;  %v1168_v32 = vpop.f32.mrb[3].mxu0  ;;  %v1641_v60 = vadd.f32 %v2048_v58, %v1166_v33  ;;  %v2595_v14 = vpack.c.bf16 %v2047_v29, %v2046_v28 }
 0x172   : > { %v2014_v24 = vmul.f32 -1.442695, %v1300_v59  ;;  %v1284_v34 = vadd.f32 %v2012_v21, %v1168_v32  ;;  %v1245_v35 = vpop.f32.mrb[3].mxu1  ;;  %v2043_v21 = vld [vmem:[%s3863_s4 + $0x158] sm:$0xff] }
 0x173   : > { %v1295_v42 = vadd.f32 %v2013_v38, %v1245_v35  ;;  %v2587_v22 = vpack.c.bf16 %v2043_v21, %v2042_v20 }
 0x174   : > { %2624 = vpow2.f32 %v2014_v24  ;;  %v1301_v36 = vadd.f32 %v1299_v31, %v1284_v34 }
 0x176   : > { %v2015_v37 = vmul.f32 -1.442695, %v1301_v36 }
 0x178   : > { %2626 = vpow2.f32 %v2015_v37 }
 0x179   : > { %2628 = vtanh.f32 %v1294_v39 }
 0x17e   : > { %v2625_v40 = vpop.eup %2624 }
 0x17f   : > { %v1308_v41 = vadd.f32 1.0, %v2625_v40 }
 0x181   : > { %2630 = vrcp.f32 %v1308_v41 }
 0x182   : > { %v2627_v43 = vpop.eup %2626  ;;  %2632 = vtanh.f32 %v1295_v42 }
 0x183   : > { %v1309_v44 = vadd.f32 1.0, %v2627_v43  ;;  %v2629_v45 = vpop.eup %2628 }
 0x185   : > { %2634 = vrcp.f32 %v1309_v44 }
 0x18b   : > { %v2631_v46 = vpop.eup %2630 }
 0x18c   : > { %v1314_v47 = vsub.f32 1.0, %v2631_v46  ;;  %v1320_v48 = vmul.f32 %v2631_v46, %v2629_v45  ;;  %v2633_v49 = vpop.eup %2632  ;;  %v2049_v45 = vld [vmem:[%s3862_s3 + $0x2] ss:$0 sm:$0xff] }
 0x18e   : > { %v1316_v50 = vmul.f32 %v1314_v47, %v1272_v18 }
 0x18f   : > { %v2635_v51 = vpop.eup %2634 }
 0x190   : > { %v1322_v52 = vadd.f32 %v1320_v48, %v1316_v50  ;;  %v1315_v53 = vsub.f32 1.0, %v2635_v51  ;;  %v1321_v54 = vmul.f32 %v2635_v51, %v2633_v49 }
 0x192   : > { %1324 = vst [vmem:[%s373_s16] sm:$0xff] %v1322_v52  ;;  %1326 = vst [vmem:[#allocation3 + $0x10] sm:$0xff] %v1322_v52  ;;  %v1317_v55 = vmul.f32 %v1315_v53, %v1273_v27  ;;  %2177 = vmatprep.mubr.f32.mxu1 %v1322_v52  ;;  %v2591_v27 = vpack.c.bf16 %v2045_v26, %v2044_v23 }
 0x194   : > { %v1323_v57 = vadd.f32 %v1321_v54, %v1317_v55 }
 0x196   : > { %1325 = vst [vmem:[%s373_s16 + $0x8] sm:$0xff] %v1323_v57  ;;  %1327 = vst [vmem:[#allocation3 + $0x18] sm:$0xff] %v1323_v57  ;;  %2178 = vmatmul.mubr.f32.vlgmr.msra.gmra.mrb[4].mxu1 %v1323_v57  ;;  %v1665_v61 = vmul.f32 %v1663_v56, %v1323_v57  ;;  %v1627_v56 = vld [vmem:[%s2943_s24] sm:$0xff] }
 0x198   : > { %v1667_v62 = vadd.f32 %v1665_v61, %v1641_v60  ;;  %v2648_v60 = vld [vmem:[#allocation2 + $0x30] sm:$0xff] }
 0x199   : > { %v1330_v63 = vld [vmem:[#allocation3 + $0xf] sm:$0xff] }
 0x19a   : > { %2142 = vmatprep.mubr.f32.mxu0 %v1330_v63  ;;  %v1629_v8 = vld [vmem:[%s373_s16] sm:$0xff]  ;;  %v2052_v38 = vmul.f32 -1.442695, %v1667_v62 }
 0x19b   : > { %v1664_v10 = vmul.f32 %v1662_v4, %v1629_v8 }
 0x19c   : > { %2636 = vpow2.f32 %v2052_v38 }
 0x19d   : > { %v1331_v5 = vld [vmem:[#allocation3 + $0x17] sm:$0xff]  ;;  %v1666_v15 = vadd.f32 %v1664_v10, %v1640_v9 }
 0x19e   : > { %v1529_v6 = vld [vmem:[#allocation3 + $0x11] sm:$0xff]  ;;  %2143 = vmatmul.mubr.f32.vlgmr.msra.gmra.mrb[4].mxu0 %v1331_v5  ;;  %v1530_v59 = vld [vmem:[#allocation3 + $0x19] sm:$0xff] }
 0x19f   : > { %2570 = vmatpush3.bf16.msra.mxu0 %v3758_v30  ;;  %2212 = vmatprep.mubr.f32.mxu0 %v1529_v6  ;;  %v2041_v30 = vld [vmem:[%s3863_s4 + $0x148] sm:$0xff]  ;;  %v2051_v39 = vmul.f32 -1.442695, %v1666_v15 }
 0x1a0   : > { %2572 = vmatprep.subr.bf16.mxu0 %v2571_v2  ;;  %v2583_v18 = vpack.c.bf16 %v2041_v30, %v2040_v17 }
 0x1a1   : > { %2638 = vpow2.f32 %v2051_v39 }
 0x1a3   : > { %2574 = vmatpush3.bf16.msra.mxu0 %v2571_v2 }
 0x1a4   : > { %2576 = vmatprep.subr.bf16.mxu0 %v2575_v12 }
 0x1a6   : > { %v2637_v40 = vpop.eup %2636 }
 0x1a7   : > { %2578 = vmatpush3.bf16.msra.mxu0 %v2575_v12  ;;  %v1675_v42 = vadd.f32 1.0, %v2637_v40 }
 0x1a8   : > { %2580 = vmatprep.subr.bf16.mxu0 %v2579_v16 }
 0x1a9   : > { %2640 = vrcp.f32 %v1675_v42 }
 0x1ab   : > { %2582 = vmatpush3.bf16.msra.mxu0 %v2579_v16  ;;  %v2639_v41 = vpop.eup %2638 }
 0x1ac   : > { %2584 = vmatprep.subr.bf16.mxu0 %v2583_v18  ;;  %v1674_v43 = vadd.f32 1.0, %v2639_v41 }
 0x1ae   : > { %2642 = vrcp.f32 %v1674_v43 }
 0x1af   : > { %2586 = vmatpush3.bf16.msra.mxu0 %v2583_v18 }
 0x1b0   : > { %2588 = vmatprep.subr.bf16.mxu0 %v2587_v22 }
 0x1b3   : > { %2590 = vmatpush3.bf16.msra.mxu0 %v2587_v22  ;;  %v2641_v52 = vpop.eup %2640 }
 0x1b4   : > { %2592 = vmatprep.subr.bf16.mxu0 %v2591_v27  ;;  %v1681_v54 = vsub.f32 1.0, %v2641_v52 }
 0x1b6   : > { %v1683_v61 = vmul.f32 %v2648_v60, %v1681_v54 }
 0x1b7   : > { %2594 = vmatpush3.bf16.msra.mxu0 %v2591_v27 }
 0x1b8   : > { %2596 = vmatprep.subr.bf16.mxu0 %v2595_v14  ;;  %v2643_v53 = vpop.eup %2642 }
 0x1b9   : > { %v1680_v55 = vsub.f32 1.0, %v2643_v53 }
 0x1bb   : > { %2598 = vmatpush3.bf16.msra.mxu0 %v2595_v14  ;;  %v1682_v63 = vmul.f32 %v1680_v55, %v1627_v56 }
 0x1be   : > { %2213 = vmatmul.mubr.f32.vlgmr.msra.gmra.mrb[6].mxu0 %v1530_v59 }
 0x269   : > { %v2179_v33 = vpop.f32.mrb[4].mxu1 }
 0x26a   : > { %v1514_v31 = vpop.f32.mrb[5].mxu1 }
 0x271   : > { %v2144_v32 = vpop.f32.mrb[4].mxu0 }
 0x272   : > { %v1424_v24 = vadd.f32 %v2144_v32, %v3781_v11  ;;  %v1414_v34 = vpop.f32.mrb[5].mxu0 }
 0x273   : > { %v1423_v35 = vadd.f32 %v1414_v34, %v3776_v25  ;;  %v2050_v25 = vld [vmem:[%s3864_s5] ss:$0 sm:$0xff] }
 0x274   : > { %v1524_v36 = vadd.f32 %v2179_v33, %v1424_v24 }
 0x275   : > { %v1523_v37 = vadd.f32 %v1514_v31, %v1423_v35 }
 0x291   : > { %v2214_v44 = vpop.f32.mrb[6].mxu0 }
 0x292   : > { %v1624_v46 = vadd.f32 %v2214_v44, %v1524_v36  ;;  %v1614_v11 = vpop.f32.mrb[7].mxu0 }
 0x293   : > { %v1623_v47 = vadd.f32 %v1614_v11, %v1523_v37 }
 0x294   : > { %v1652_v48 = vadd.f32 %v2049_v45, %v1624_v46 }
 0x295   : > { %v1651_v49 = vadd.f32 %v2049_v45, %v1623_v47 }
 0x296   : > { %v1661_v50 = vadd.f32 %v2050_v25, %v1652_v48 }
 0x297   : > { %v1660_v51 = vadd.f32 %v2050_v25, %v1651_v49 }
 0x298   : > { %2644 = vtanh.f32 %v1661_v50 }
 0x299   : > { %2646 = vtanh.f32 %v1660_v51 }
 0x2a2   : > { %v2645_v57 = vpop.eup %2644 }
 0x2a3   : > { %v2647_v58 = vpop.eup %2646  ;;  %v1687_v62 = vmul.f32 %v2645_v57, %v2641_v52 }
 0x2a4   : > { %v1686_v0 = vmul.f32 %v2647_v58, %v2643_v53 }
 0x2a5   : > { %v1689_v1 = vadd.f32 %v1687_v62, %v1683_v61 }
 0x2a6   : > { %v1688_v2 = vadd.f32 %v1686_v0, %v1682_v63 }
 0x2a7   : > { %1691 = vst [vmem:[%s367_s22 + $0x8] sm:$0xff] %v1689_v1 }
 0x2a8   : > { %1690 = vst [vmem:[%s367_s22] sm:$0xff] %v1688_v2 }
 0x2a9 PF: > { %s20_s30 = sadd.s32 1, %s2655_s30  }
 0x2aa   : > { %p17_p4 = scmp.ge.s32.totalorder %s20_s30, 4  }
 0x2ac   :  { %19 = sbr.rel (!%p17_p4) target bundleno = 1 (0x1), region = 103 }

</bundles_post_ra>
